<compile_context>
chip_gen: v7x
topology: tpu7x:2x2x1
jax: 0.10.0
libtpu: 0.0.40
codegen_flags: <defaults>
</compile_context>

<pallas_src>
import functools

import jax
import jax.numpy as jnp
from jax import lax
from jax.experimental import pallas as pl
from jax.experimental.pallas import tpu as pltpu

_HP = jax.lax.Precision.HIGHEST


def _interleave_gates(a_k, a_v, hs):
    """(..., 4*hs) x2 -> (..., 8*hs); columns [i_k i_v | f_k f_v | g_k g_v | o_k o_v]."""
    shp = a_k.shape[:-1]
    a = jnp.stack([a_k.reshape(*shp, 4, hs), a_v.reshape(*shp, 4, hs)], axis=-2)
    return a.reshape(*shp, 8 * hs)


# ----------------------------------------------------------------------------
# Pallas kernel: one chunk of Tc timesteps; weights + running state resident.
# ----------------------------------------------------------------------------
def _hrnn_chunk_kernel(
    # streamed per chunk: precomputed SRNN input pre-activations (+ biases)
    gx_ref,                                  # (Tc, B, 8Hs)
    # resident initial states (used only at chunk 0)
    hs0_ref, hu0_ref, cs0_ref, cu0_ref,      # (B,2Hs),(B,Hu),(B,2Hs),(B,Hu)
    # resident URNN weights / bias and folded SRNN feedback weight
    w_us_ref, w_uu_ref, b_u_ref, w_fb_ref,   # (2Hs,4Hu),(Hu,4Hu),(B,4Hu),(Hu,8Hs)
    # outputs: final states, written once at the last chunk
    hs_out, hu_out, cs_out, cu_out,          # (B,2Hs),(B,Hu),(B,2Hs),(B,Hu)
    # VMEM scratch: state carried across chunks
    hs_s, hu_s, cs_s, cu_s,
    *, srnn_hid, urnn_hid, seq_len, chunk, unroll,
):
    c = pl.program_id(0)
    Hs, Hu = srnn_hid, urnn_hid
    S2 = 2 * Hs
    B = hs0_ref.shape[0]

    @pl.when(c == 0)
    def _init():
        hs_s[...] = hs0_ref[...]
        hu_s[...] = hu0_ref[...]
        cs_s[...] = cs0_ref[...]
        cu_s[...] = cu0_ref[...]

    # Hoisted per-chunk: weight loads, bias, constant gate lane-masks.
    w_us = w_us_ref[...]
    w_uu = w_uu_ref[...]
    b_u = b_u_ref[...]
    w_fb = w_fb_ref[...]
    lane_u = lax.broadcasted_iota(jnp.int32, (B, 4 * Hu), 1)
    gmask_u = (lane_u >= 2 * Hu) & (lane_u < 3 * Hu)     # tanh block (g gate)
    lane_s = lax.broadcasted_iota(jnp.int32, (B, 4 * S2), 1)
    gmask_s = (lane_s >= 2 * S2) & (lane_s < 3 * S2)

    t0 = c * chunk

    def step(i, carry):
        hs, hu, cs, cu = carry

        # --- URNN LSTM on (prev [hk|hv], prev hu) ---------------------------
        gu_pre = (
            jnp.dot(hs, w_us, preferred_element_type=jnp.float32)
            + jnp.dot(hu, w_uu, preferred_element_type=jnp.float32)
            + b_u
        )                                                  # (B, 4Hu) [i f g o]
        act_u = jnp.where(gmask_u, jnp.tanh(gu_pre), jax.nn.sigmoid(gu_pre))
        cu_n = act_u[:, Hu:2 * Hu] * cu + act_u[:, 0:Hu] * act_u[:, 2 * Hu:3 * Hu]
        hu_n = act_u[:, 3 * Hu:4 * Hu] * jnp.tanh(cu_n)

        # --- fused k/v SRNN LSTMs (feedback linear folded into w_fb; the
        #     x-projection and all SRNN biases are precomputed in gx) --------
        gs_pre = gx_ref[i] + jnp.dot(hu_n, w_fb, preferred_element_type=jnp.float32)
        act_s = jnp.where(gmask_s, jnp.tanh(gs_pre), jax.nn.sigmoid(gs_pre))
        cs_n = act_s[:, S2:2 * S2] * cs + act_s[:, 0:S2] * act_s[:, 2 * S2:3 * S2]
        hs_n = act_s[:, 3 * S2:4 * S2] * jnp.tanh(cs_n)

        if seq_len % chunk != 0:                           # trace-time branch
            valid = (t0 + i) < seq_len
            hs_n = jnp.where(valid, hs_n, hs)
            hu_n = jnp.where(valid, hu_n, hu)
            cs_n = jnp.where(valid, cs_n, cs)
            cu_n = jnp.where(valid, cu_n, cu)
        return hs_n, hu_n, cs_n, cu_n

    carry0 = (hs_s[...], hu_s[...], cs_s[...], cu_s[...])
    hs_f, hu_f, cs_f, cu_f = lax.fori_loop(0, chunk, step, carry0, unroll=unroll)

    hs_s[...] = hs_f
    hu_s[...] = hu_f
    cs_s[...] = cs_f
    cu_s[...] = cu_f

    @pl.when(c == pl.num_programs(0) - 1)
    def _finalize():
        hs_out[...] = hs_f
        hu_out[...] = hu_f
        cs_out[...] = cs_f
        cu_out[...] = cu_f


# ----------------------------------------------------------------------------
# One-time parameter packing (transpose / bias merge / Wo-fold), off hot path.
# ----------------------------------------------------------------------------
def prepare_packed_params(params, k_dim, v_dim, srnn_hid, urnn_hid):
    Hs, Hu = srnn_hid, urnn_hid
    pk, pv, pu = params["kSRNN"], params["vSRNN"], params["URNN"]
    Wo = params["urnn_out_layer"]["weight"]          # (2Hs, Hu)
    bo = params["urnn_out_layer"]["bias"]            # (2Hs,)

    # URNN: split stacked projection so the kernel never packs hu with [hk|hv].
    w_us = pu["weight_ih"].T                         # (2Hs, 4Hu)
    w_uu = pu["weight_hh"].T                         # (Hu, 4Hu)
    b_u = pu["bias_ih"] + pu["bias_hh"]              # (4Hu,)

    # SRNNs: fold urnn_out_layer into the recurrent weights.
    #   hk_fb @ Whh_k^T = hu_new @ (Wo_k^T @ Whh_k^T) + bo_k @ Whh_k^T
    def srnn_parts(p, wo_m, bo_m):
        wih_t = p["weight_ih"].T                     # (Dm, 4Hs)
        whh_t = p["weight_hh"].T                     # (Hs, 4Hs)
        w_fb = jnp.dot(wo_m.T, whh_t, precision=_HP)             # (Hu, 4Hs)
        b = p["bias_ih"] + p["bias_hh"] + jnp.dot(bo_m, whh_t, precision=_HP)
        return wih_t, w_fb, b

    w_xk, wfb_k, b_k = srnn_parts(pk, Wo[:Hs], bo[:Hs])
    w_xv, wfb_v, b_v = srnn_parts(pv, Wo[Hs:], bo[Hs:])

    return {
        "w_xk": w_xk, "w_xv": w_xv,                        # (Dk,4Hs), (Dv,4Hs)
        "b_s": _interleave_gates(b_k, b_v, Hs),            # (8Hs,)
        "w_fb": _interleave_gates(wfb_k, wfb_v, Hs),       # (Hu, 8Hs)
        "w_us": w_us, "w_uu": w_uu, "b_u": b_u,
        "srnn_hid": Hs, "urnn_hid": Hu,
    }


# ----------------------------------------------------------------------------
# Wrappers.
# ----------------------------------------------------------------------------
def hierarchical_rnn_cell_seq(xk_seq, xv_seq, states, packed, *, chunk=128, unroll=8):
    """Run T timesteps inside one chunked Pallas kernel; return final states."""
    (hk, ck), (hv, cv), (hu, cu) = states
    T, B, _ = xk_seq.shape
    Hs, Hu = packed["srnn_hid"], packed["urnn_hid"]
    S2 = 2 * Hs

    Tc = max(1, min(chunk, T))
    nchunks = (T + Tc - 1) // Tc
    T_pad = nchunks * Tc

    # Input projection hoisted out of the recurrence: one (T*B, D) matmul per
    # modality, interleaved to the in-kernel gate layout, with all SRNN biases
    # (incl. the folded urnn_out bias) added here once.
    gk = jnp.dot(xk_seq.reshape(T * B, -1), packed["w_xk"], precision=_HP)
    gv = jnp.dot(xv_seq.reshape(T * B, -1), packed["w_xv"], precision=_HP)
    gates_x = (_interleave_gates(gk, gv, Hs) + packed["b_s"]).reshape(T, B, 8 * Hs)
    if T_pad != T:
        gates_x = jnp.pad(gates_x, ((0, T_pad - T), (0, 0), (0, 0)))

    hs0 = jnp.concatenate([hk, hv], axis=-1)               # (B, 2Hs)
    cs0 = jnp.concatenate([ck, cv], axis=-1)               # (B, 2Hs)
    b_u = jnp.broadcast_to(packed["b_u"].reshape(1, -1), (B, 4 * Hu))

    def const_spec(shape):
        return pl.BlockSpec(shape, lambda c: (0,) * len(shape))

    kernel = functools.partial(
        _hrnn_chunk_kernel, srnn_hid=Hs, urnn_hid=Hu,
        seq_len=T, chunk=Tc, unroll=max(1, min(unroll, Tc)))

    hs_n, hu_n, cs_n, cu_n = pl.pallas_call(
        kernel,
        out_shape=(
            jax.ShapeDtypeStruct((B, S2), jnp.float32),
            jax.ShapeDtypeStruct((B, Hu), jnp.float32),
            jax.ShapeDtypeStruct((B, S2), jnp.float32),
            jax.ShapeDtypeStruct((B, Hu), jnp.float32),
        ),
        grid=(nchunks,),
        in_specs=[
            pl.BlockSpec((Tc, B, 8 * Hs), lambda c: (c, 0, 0)),  # streamed gates_x
            const_spec((B, S2)), const_spec((B, Hu)),            # initial h
            const_spec((B, S2)), const_spec((B, Hu)),            # initial c
            const_spec((S2, 4 * Hu)), const_spec((Hu, 4 * Hu)),  # URNN weights
            const_spec((B, 4 * Hu)), const_spec((Hu, 8 * Hs)),   # bias, feedback
        ],
        out_specs=(
            const_spec((B, S2)), const_spec((B, Hu)),
            const_spec((B, S2)), const_spec((B, Hu)),
        ),
        scratch_shapes=[
            pltpu.VMEM((B, S2), jnp.float32), pltpu.VMEM((B, Hu), jnp.float32),
            pltpu.VMEM((B, S2), jnp.float32), pltpu.VMEM((B, Hu), jnp.float32),
        ],
        compiler_params=pltpu.CompilerParams(dimension_semantics=("arbitrary",)),
    )(gates_x, hs0, hu, cs0, cu,
      packed["w_us"], packed["w_uu"], b_u, packed["w_fb"])

    return [(hs_n[:, :Hs], cs_n[:, :Hs]),
            (hs_n[:, Hs:], cs_n[:, Hs:]),
            (hu_n, cu_n)]


def get_initial_states(x, packed):
    B = x.shape[0]
    Hs, Hu = packed["srnn_hid"], packed["urnn_hid"]
    z = lambda n: jnp.zeros((B, n), jnp.float32)
    return [(z(Hs), z(Hs)), (z(Hs), z(Hs)), (z(Hu), z(Hu))]


def hierarchical_rnn_cell(xk, xv, states, packed):
    """One forward step (matches the PyTorch module's forward) via T=1 kernel."""
    if states is None:
        states = get_initial_states(xk, packed)
    return hierarchical_rnn_cell_seq(xk[None], xv[None], states, packed)


# ----------------------------------------------------------------------------
# Pure-JAX reference (unfused, per-step — mirrors the PyTorch module).
# ----------------------------------------------------------------------------
def _lstm_ref(x, h, c, p):
    gates = (jnp.dot(x, p["weight_ih"].T, precision=_HP) + p["bias_ih"]
             + jnp.dot(h, p["weight_hh"].T, precision=_HP) + p["bias_hh"])
    hid = h.shape[1]
    i = jax.nn.sigmoid(gates[:, 0 * hid:1 * hid])
    f = jax.nn.sigmoid(gates[:, 1 * hid:2 * hid])
    g = jnp.tanh(gates[:, 2 * hid:3 * hid])
    o = jax.nn.sigmoid(gates[:, 3 * hid:4 * hid])
    c_new = f * c + i * g
    h_new = o * jnp.tanh(c_new)
    return h_new, c_new


def hierarchical_rnn_cell_ref(xk, xv, states, params):
    (hk, ck), (hv, cv), (hu, cu) = states
    srnn_hid = hk.shape[1]
    urnn_input = jnp.concatenate([hk, hv], axis=-1)
    hu_n, cu_n = _lstm_ref(urnn_input, hu, cu, params["URNN"])
    urnn_out = (jnp.dot(hu_n, params["urnn_out_layer"]["weight"].T, precision=_HP)
                + params["urnn_out_layer"]["bias"])
    hk_fb, hv_fb = urnn_out[:, :srnn_hid], urnn_out[:, srnn_hid:]
    hk_n, ck_n = _lstm_ref(xk, hk_fb, ck, params["kSRNN"])
    hv_n, cv_n = _lstm_ref(xv, hv_fb, cv, params["vSRNN"])
    return [(hk_n, ck_n), (hv_n, cv_n), (hu_n, cu_n)]


# ----------------------------------------------------------------------------
# Deterministic parameter construction (PyTorch-style uniform init shapes).
# ----------------------------------------------------------------------------
def make_params(key, k_dim, v_dim, srnn_hid, urnn_hid):
    def lstm_params(key, in_dim, hid):
        k1, k2, k3, k4 = jax.random.split(key, 4)
        s = 1.0 / jnp.sqrt(hid)
        return {
            "weight_ih": jax.random.uniform(k1, (4 * hid, in_dim), jnp.float32, -s, s),
            "weight_hh": jax.random.uniform(k2, (4 * hid, hid), jnp.float32, -s, s),
            "bias_ih": jax.random.uniform(k3, (4 * hid,), jnp.float32, -s, s),
            "bias_hh": jax.random.uniform(k4, (4 * hid,), jnp.float32, -s, s),
        }

    k_k, k_v, k_u, k_o1, k_o2 = jax.random.split(key, 5)
    modal_num = 2
    s = 1.0 / jnp.sqrt(urnn_hid)
    return {
        "kSRNN": lstm_params(k_k, k_dim, srnn_hid),
        "vSRNN": lstm_params(k_v, v_dim, srnn_hid),
        "URNN": lstm_params(k_u, srnn_hid * modal_num, urnn_hid),
        "urnn_out_layer": {
            "weight": jax.random.uniform(
                k_o1, (srnn_hid * modal_num, urnn_hid), jnp.float32, -s, s),
            "bias": jax.random.uniform(
                k_o2, (srnn_hid * modal_num,), jnp.float32, -s, s),
        },
    }


if __name__ == "__main__":
    T, B = 8, 8                    # batch padded to the f32 sublane count
    K_DIM, V_DIM = 12, 20          # srnn_input_dims = {'k': 12, 'v': 20}
    SRNN_HID, URNN_HID = 32, 16

    key = jax.random.PRNGKey(0)
    kp, kxk, kxv, ks = jax.random.split(key, 4)
    params = make_params(kp, K_DIM, V_DIM, SRNN_HID, URNN_HID)
    packed = prepare_packed_params(params, K_DIM, V_DIM, SRNN_HID, URNN_HID)

    xk_seq = jax.random.normal(kxk, (T, B, K_DIM), jnp.float32)
    xv_seq = jax.random.normal(kxv, (T, B, V_DIM), jnp.float32)

    # Non-zero previous states to exercise the full datapath.
    s1, s2, s3, s4, s5, s6 = jax.random.split(ks, 6)
    states = (
        (jax.random.normal(s1, (B, SRNN_HID), jnp.float32),
         jax.random.normal(s2, (B, SRNN_HID), jnp.float32)),
        (jax.random.normal(s3, (B, SRNN_HID), jnp.float32),
         jax.random.normal(s4, (B, SRNN_HID), jnp.float32)),
        (jax.random.normal(s5, (B, URNN_HID), jnp.float32),
         jax.random.normal(s6, (B, URNN_HID), jnp.float32)),
    )

    # Pure-JAX reference run (per-step, unfused).
    ref_states = states
    for t in range(T):
        ref_states = hierarchical_rnn_cell_ref(xk_seq[t], xv_seq[t], ref_states, params)

    # Wo-fold reorders f32 accumulation -> slightly looser tolerance than 1e-5.
    TOL = 5e-4

    def check(got, want, tag):
        for a_pair, b_pair in zip(got, want):
            for a, b in zip(a_pair, b_pair):
                assert a.shape == b.shape and a.dtype == b.dtype
                err = float(jnp.max(jnp.abs(a - b)))
                assert err < TOL, f"{tag} mismatch vs reference: {err}"

    # ---- multi-step kernel, single chunk (T <= Tc) --------------------------
    out = jax.block_until_ready(hierarchical_rnn_cell_seq(xk_seq, xv_seq, states, packed))
    check(out, ref_states, "seq")

    # ---- multi-chunk + ragged-tail path (T=8, chunk=3 -> 3 chunks, masked) --
    out_c = jax.block_until_ready(
        hierarchical_rnn_cell_seq(xk_seq, xv_seq, states, packed, chunk=3))
    check(out_c, ref_states, "chunked seq")

    # ---- single-step path (== the PyTorch module's forward) -----------------
    out1 = jax.block_until_ready(hierarchical_rnn_cell(xk_seq[0], xv_seq[0], states, packed))
    ref1 = hierarchical_rnn_cell_ref(xk_seq[0], xv_seq[0], states, params)
    check(out1, ref1, "single-step")

    print("KERNEL_OK")
</pallas_src>

<mosaic_0001>
module attributes {stable_mosaic.version = 11 : i64} {
  func.func @_hrnn_chunk_kernel(%arg0: i32, %arg1: memref<8x8x256xf32, #tpu.memory_space<vmem>>, %arg2: memref<8x64xf32, #tpu.memory_space<vmem>>, %arg3: memref<8x16xf32, #tpu.memory_space<vmem>>, %arg4: memref<8x64xf32, #tpu.memory_space<vmem>>, %arg5: memref<8x16xf32, #tpu.memory_space<vmem>>, %arg6: memref<64x64xf32, #tpu.memory_space<vmem>>, %arg7: memref<16x64xf32, #tpu.memory_space<vmem>>, %arg8: memref<8x64xf32, #tpu.memory_space<vmem>>, %arg9: memref<16x256xf32, #tpu.memory_space<vmem>>, %arg10: memref<8x64xf32, #tpu.memory_space<vmem>>, %arg11: memref<8x16xf32, #tpu.memory_space<vmem>>, %arg12: memref<8x64xf32, #tpu.memory_space<vmem>>, %arg13: memref<8x16xf32, #tpu.memory_space<vmem>>, %arg14: memref<8x64xf32, #tpu.memory_space<vmem>>, %arg15: memref<8x16xf32, #tpu.memory_space<vmem>>, %arg16: memref<8x64xf32, #tpu.memory_space<vmem>>, %arg17: memref<8x16xf32, #tpu.memory_space<vmem>>) attributes {dimension_semantics = [#tpu.dimension_semantics<arbitrary>], iteration_bounds = array<i64: 1>, scalar_prefetch = 0 : i64, scratch_operands = 4 : i64, tpu.core_type = #tpu.core_type<tc>, window_params = [{transform_indices = @transform_0, window_bounds = array<i64: 8, 8, 256>}, {pipeline_mode = #tpu.pipeline_mode<synchronous>, transform_indices = @transform_1, window_bounds = array<i64: 8, 64>}, {pipeline_mode = #tpu.pipeline_mode<synchronous>, transform_indices = @transform_2, window_bounds = array<i64: 8, 16>}, {pipeline_mode = #tpu.pipeline_mode<synchronous>, transform_indices = @transform_3, window_bounds = array<i64: 8, 64>}, {pipeline_mode = #tpu.pipeline_mode<synchronous>, transform_indices = @transform_4, window_bounds = array<i64: 8, 16>}, {pipeline_mode = #tpu.pipeline_mode<synchronous>, transform_indices = @transform_5, window_bounds = array<i64: 64, 64>}, {pipeline_mode = #tpu.pipeline_mode<synchronous>, transform_indices = @transform_6, window_bounds = array<i64: 16, 64>}, {pipeline_mode = #tpu.pipeline_mode<synchronous>, transform_indices = @transform_7, window_bounds = array<i64: 8, 64>}, {pipeline_mode = #tpu.pipeline_mode<synchronous>, transform_indices = @transform_8, window_bounds = array<i64: 16, 256>}, {pipeline_mode = #tpu.pipeline_mode<synchronous>, transform_indices = @transform_9, window_bounds = array<i64: 8, 64>}, {pipeline_mode = #tpu.pipeline_mode<synchronous>, transform_indices = @transform_10, window_bounds = array<i64: 8, 16>}, {pipeline_mode = #tpu.pipeline_mode<synchronous>, transform_indices = @transform_11, window_bounds = array<i64: 8, 64>}, {pipeline_mode = #tpu.pipeline_mode<synchronous>, transform_indices = @transform_12, window_bounds = array<i64: 8, 16>}]} {
    %c0_i32 = arith.constant 0 : i32
    %0 = arith.cmpi eq, %arg0, %c0_i32 : i32
    %1 = arith.extui %0 : i1 to i32
    %c0_i32_0 = arith.constant 0 : i32
    %2 = arith.cmpi ne, %1, %c0_i32_0 : i32
    scf.if %2 {
      %c0_82 = arith.constant 0 : index
      %c0_83 = arith.constant 0 : index
      %358 = vector.load %arg2[%c0_82, %c0_83] : memref<8x64xf32, #tpu.memory_space<vmem>>, vector<8x64xf32>
      %c0_84 = arith.constant 0 : index
      %c0_85 = arith.constant 0 : index
      %359 = vector.load %arg14[%c0_84, %c0_85] : memref<8x64xf32, #tpu.memory_space<vmem>>, vector<8x64xf32>
      tpu.vector_store %arg14[%c0_84, %c0_85], %358 {strides = array<i32>} : memref<8x64xf32, #tpu.memory_space<vmem>>, vector<8x64xf32>,
      %c0_86 = arith.constant 0 : index
      %c0_87 = arith.constant 0 : index
      %360 = vector.load %arg3[%c0_86, %c0_87] : memref<8x16xf32, #tpu.memory_space<vmem>>, vector<8x16xf32>
      %c0_88 = arith.constant 0 : index
      %c0_89 = arith.constant 0 : index
      %361 = vector.load %arg15[%c0_88, %c0_89] : memref<8x16xf32, #tpu.memory_space<vmem>>, vector<8x16xf32>
      tpu.vector_store %arg15[%c0_88, %c0_89], %360 {strides = array<i32>} : memref<8x16xf32, #tpu.memory_space<vmem>>, vector<8x16xf32>,
      %c0_90 = arith.constant 0 : index
      %c0_91 = arith.constant 0 : index
      %362 = vector.load %arg4[%c0_90, %c0_91] : memref<8x64xf32, #tpu.memory_space<vmem>>, vector<8x64xf32>
      %c0_92 = arith.constant 0 : index
      %c0_93 = arith.constant 0 : index
      %363 = vector.load %arg16[%c0_92, %c0_93] : memref<8x64xf32, #tpu.memory_space<vmem>>, vector<8x64xf32>
      tpu.vector_store %arg16[%c0_92, %c0_93], %362 {strides = array<i32>} : memref<8x64xf32, #tpu.memory_space<vmem>>, vector<8x64xf32>,
      %c0_94 = arith.constant 0 : index
      %c0_95 = arith.constant 0 : index
      %364 = vector.load %arg5[%c0_94, %c0_95] : memref<8x16xf32, #tpu.memory_space<vmem>>, vector<8x16xf32>
      %c0_96 = arith.constant 0 : index
      %c0_97 = arith.constant 0 : index
      %365 = vector.load %arg17[%c0_96, %c0_97] : memref<8x16xf32, #tpu.memory_space<vmem>>, vector<8x16xf32>
      tpu.vector_store %arg17[%c0_96, %c0_97], %364 {strides = array<i32>} : memref<8x16xf32, #tpu.memory_space<vmem>>, vector<8x16xf32>,
    } else {
    }
    %c0 = arith.constant 0 : index
    %c0_1 = arith.constant 0 : index
    %3 = vector.load %arg6[%c0, %c0_1] : memref<64x64xf32, #tpu.memory_space<vmem>>, vector<64x64xf32>
    %c0_2 = arith.constant 0 : index
    %c0_3 = arith.constant 0 : index
    %4 = vector.load %arg7[%c0_2, %c0_3] : memref<16x64xf32, #tpu.memory_space<vmem>>, vector<16x64xf32>
    %c0_4 = arith.constant 0 : index
    %c0_5 = arith.constant 0 : index
    %5 = vector.load %arg8[%c0_4, %c0_5] : memref<8x64xf32, #tpu.memory_space<vmem>>, vector<8x64xf32>
    %c0_6 = arith.constant 0 : index
    %c0_7 = arith.constant 0 : index
    %6 = vector.load %arg9[%c0_6, %c0_7] : memref<16x256xf32, #tpu.memory_space<vmem>>, vector<16x256xf32>
    %7 = tpu.iota {dimensions = array<i32: 1>} : vector<8x64xi32>
    %c32_i32 = arith.constant 32 : i32
    %8 = vector.broadcast %c32_i32 : i32 to vector<8x64xi32>
    %9 = arith.cmpi sge, %7, %8 : vector<8x64xi32>
    %c48_i32 = arith.constant 48 : i32
    %10 = vector.broadcast %c48_i32 : i32 to vector<8x64xi32>
    %11 = arith.cmpi slt, %7, %10 : vector<8x64xi32>
    %12 = arith.andi %9, %11 : vector<8x64xi1>
    %13 = tpu.iota {dimensions = array<i32: 1>} : vector<8x256xi32>
    %c128_i32 = arith.constant 128 : i32
    %14 = vector.broadcast %c128_i32 : i32 to vector<8x256xi32>
    %15 = arith.cmpi sge, %13, %14 : vector<8x256xi32>
    %c192_i32 = arith.constant 192 : i32
    %16 = vector.broadcast %c192_i32 : i32 to vector<8x256xi32>
    %17 = arith.cmpi slt, %13, %16 : vector<8x256xi32>
    %18 = arith.andi %15, %17 : vector<8x256xi1>
    %c0_8 = arith.constant 0 : index
    %c0_9 = arith.constant 0 : index
    %19 = vector.load %arg14[%c0_8, %c0_9] : memref<8x64xf32, #tpu.memory_space<vmem>>, vector<8x64xf32>
    %c0_10 = arith.constant 0 : index
    %c0_11 = arith.constant 0 : index
    %20 = vector.load %arg15[%c0_10, %c0_11] : memref<8x16xf32, #tpu.memory_space<vmem>>, vector<8x16xf32>
    %c0_12 = arith.constant 0 : index
    %c0_13 = arith.constant 0 : index
    %21 = vector.load %arg16[%c0_12, %c0_13] : memref<8x64xf32, #tpu.memory_space<vmem>>, vector<8x64xf32>
    %c0_14 = arith.constant 0 : index
    %c0_15 = arith.constant 0 : index
    %22 = vector.load %arg17[%c0_14, %c0_15] : memref<8x16xf32, #tpu.memory_space<vmem>>, vector<8x16xf32>
    %c0_i32_16 = arith.constant 0 : i32
    %cst = arith.constant dense<0.000000e+00> : vector<8x64xf32>
    %23 = tpu.matmul %19, %3, %cst {dimension_numbers = #tpu.dot_dimension_numbers<[1], [0], [0], [1], [0, 0, 1, 1], [], []>} : vector<8x64xf32>, vector<64x64xf32>, vector<8x64xf32> -> vector<8x64xf32>
    %cst_17 = arith.constant dense<0.000000e+00> : vector<8x64xf32>
    %24 = tpu.matmul %20, %4, %cst_17 {dimension_numbers = #tpu.dot_dimension_numbers<[1], [0], [0], [1], [0, 0, 1, 1], [], []>} : vector<8x16xf32>, vector<16x64xf32>, vector<8x64xf32> -> vector<8x64xf32>
    %25 = arith.addf %23, %24 : vector<8x64xf32>
    %26 = arith.addf %25, %5 : vector<8x64xf32>
    %27 = math.tanh %26 : vector<8x64xf32>
    %28 = arith.negf %26 : vector<8x64xf32>
    %29 = math.exp %28 : vector<8x64xf32>
    %cst_18 = arith.constant 1.000000e+00 : f32
    %30 = vector.broadcast %cst_18 : f32 to vector<8x64xf32>
    %31 = arith.addf %30, %29 : vector<8x64xf32>
    %32 = arith.divf %30, %31 : vector<8x64xf32>
    %33 = arith.select %12, %27, %32 : vector<8x64xi1>, vector<8x64xf32>
    %34 = vector.extract_strided_slice %33 {offsets = [0, 16], sizes = [8, 16], strides = [1, 1]} : vector<8x64xf32> to vector<8x16xf32>
    %35 = arith.mulf %34, %22 : vector<8x16xf32>
    %36 = vector.extract_strided_slice %33 {offsets = [0, 0], sizes = [8, 16], strides = [1, 1]} : vector<8x64xf32> to vector<8x16xf32>
    %37 = vector.extract_strided_slice %33 {offsets = [0, 32], sizes = [8, 16], strides = [1, 1]} : vector<8x64xf32> to vector<8x16xf32>
    %38 = arith.mulf %36, %37 : vector<8x16xf32>
    %39 = arith.addf %35, %38 : vector<8x16xf32>
    %40 = vector.extract_strided_slice %33 {offsets = [0, 48], sizes = [8, 16], strides = [1, 1]} : vector<8x64xf32> to vector<8x16xf32>
    %41 = math.tanh %39 : vector<8x16xf32>
    %42 = arith.mulf %40, %41 : vector<8x16xf32>
    %43 = arith.index_cast %c0_i32_16 : i32 to index
    %c0_19 = arith.constant 0 : index
    %c0_20 = arith.constant 0 : index
    %44 = vector.load %arg1[%43, %c0_19, %c0_20] : memref<8x8x256xf32, #tpu.memory_space<vmem>>, vector<1x8x256xf32>
    %45 = vector.shape_cast %44 : vector<1x8x256xf32> to vector<8x256xf32>
    %cst_21 = arith.constant dense<0.000000e+00> : vector<8x256xf32>
    %46 = tpu.matmul %42, %6, %cst_21 {dimension_numbers = #tpu.dot_dimension_numbers<[1], [0], [0], [1], [0, 0, 1, 1], [], []>} : vector<8x16xf32>, vector<16x256xf32>, vector<8x256xf32> -> vector<8x256xf32>
    %47 = arith.addf %45, %46 : vector<8x256xf32>
    %48 = math.tanh %47 : vector<8x256xf32>
    %49 = arith.negf %47 : vector<8x256xf32>
    %50 = math.exp %49 : vector<8x256xf32>
    %cst_22 = arith.constant 1.000000e+00 : f32
    %51 = vector.broadcast %cst_22 : f32 to vector<8x256xf32>
    %52 = arith.addf %51, %50 : vector<8x256xf32>
    %53 = arith.divf %51, %52 : vector<8x256xf32>
    %54 = arith.select %18, %48, %53 : vector<8x256xi1>, vector<8x256xf32>
    %55 = vector.extract_strided_slice %54 {offsets = [0, 64], sizes = [8, 64], strides = [1, 1]} : vector<8x256xf32> to vector<8x64xf32>
    %56 = arith.mulf %55, %21 : vector<8x64xf32>
    %57 = vector.extract_strided_slice %54 {offsets = [0, 0], sizes = [8, 64], strides = [1, 1]} : vector<8x256xf32> to vector<8x64xf32>
    %58 = vector.extract_strided_slice %54 {offsets = [0, 128], sizes = [8, 64], strides = [1, 1]} : vector<8x256xf32> to vector<8x64xf32>
    %59 = arith.mulf %57, %58 : vector<8x64xf32>
    %60 = arith.addf %56, %59 : vector<8x64xf32>
    %61 = vector.extract_strided_slice %54 {offsets = [0, 192], sizes = [8, 64], strides = [1, 1]} : vector<8x256xf32> to vector<8x64xf32>
    %62 = math.tanh %60 : vector<8x64xf32>
    %63 = arith.mulf %61, %62 : vector<8x64xf32>
    %c1_i32 = arith.constant 1 : i32
    %cst_23 = arith.constant dense<0.000000e+00> : vector<8x64xf32>
    %64 = tpu.matmul %63, %3, %cst_23 {dimension_numbers = #tpu.dot_dimension_numbers<[1], [0], [0], [1], [0, 0, 1, 1], [], []>} : vector<8x64xf32>, vector<64x64xf32>, vector<8x64xf32> -> vector<8x64xf32>
    %cst_24 = arith.constant dense<0.000000e+00> : vector<8x64xf32>
    %65 = tpu.matmul %42, %4, %cst_24 {dimension_numbers = #tpu.dot_dimension_numbers<[1], [0], [0], [1], [0, 0, 1, 1], [], []>} : vector<8x16xf32>, vector<16x64xf32>, vector<8x64xf32> -> vector<8x64xf32>
    %66 = arith.addf %64, %65 : vector<8x64xf32>
    %67 = arith.addf %66, %5 : vector<8x64xf32>
    %68 = math.tanh %67 : vector<8x64xf32>
    %69 = arith.negf %67 : vector<8x64xf32>
    %70 = math.exp %69 : vector<8x64xf32>
    %cst_25 = arith.constant 1.000000e+00 : f32
    %71 = vector.broadcast %cst_25 : f32 to vector<8x64xf32>
    %72 = arith.addf %71, %70 : vector<8x64xf32>
    %73 = arith.divf %71, %72 : vector<8x64xf32>
    %74 = arith.select %12, %68, %73 : vector<8x64xi1>, vector<8x64xf32>
    %75 = vector.extract_strided_slice %74 {offsets = [0, 16], sizes = [8, 16], strides = [1, 1]} : vector<8x64xf32> to vector<8x16xf32>
    %76 = arith.mulf %75, %39 : vector<8x16xf32>
    %77 = vector.extract_strided_slice %74 {offsets = [0, 0], sizes = [8, 16], strides = [1, 1]} : vector<8x64xf32> to vector<8x16xf32>
    %78 = vector.extract_strided_slice %74 {offsets = [0, 32], sizes = [8, 16], strides = [1, 1]} : vector<8x64xf32> to vector<8x16xf32>
    %79 = arith.mulf %77, %78 : vector<8x16xf32>
    %80 = arith.addf %76, %79 : vector<8x16xf32>
    %81 = vector.extract_strided_slice %74 {offsets = [0, 48], sizes = [8, 16], strides = [1, 1]} : vector<8x64xf32> to vector<8x16xf32>
    %82 = math.tanh %80 : vector<8x16xf32>
    %83 = arith.mulf %81, %82 : vector<8x16xf32>
    %84 = arith.index_cast %c1_i32 : i32 to index
    %c0_26 = arith.constant 0 : index
    %c0_27 = arith.constant 0 : index
    %85 = vector.load %arg1[%84, %c0_26, %c0_27] : memref<8x8x256xf32, #tpu.memory_space<vmem>>, vector<1x8x256xf32>
    %86 = vector.shape_cast %85 : vector<1x8x256xf32> to vector<8x256xf32>
    %cst_28 = arith.constant dense<0.000000e+00> : vector<8x256xf32>
    %87 = tpu.matmul %83, %6, %cst_28 {dimension_numbers = #tpu.dot_dimension_numbers<[1], [0], [0], [1], [0, 0, 1, 1], [], []>} : vector<8x16xf32>, vector<16x256xf32>, vector<8x256xf32> -> vector<8x256xf32>
    %88 = arith.addf %86, %87 : vector<8x256xf32>
    %89 = math.tanh %88 : vector<8x256xf32>
    %90 = arith.negf %88 : vector<8x256xf32>
    %91 = math.exp %90 : vector<8x256xf32>
    %cst_29 = arith.constant 1.000000e+00 : f32
    %92 = vector.broadcast %cst_29 : f32 to vector<8x256xf32>
    %93 = arith.addf %92, %91 : vector<8x256xf32>
    %94 = arith.divf %92, %93 : vector<8x256xf32>
    %95 = arith.select %18, %89, %94 : vector<8x256xi1>, vector<8x256xf32>
    %96 = vector.extract_strided_slice %95 {offsets = [0, 64], sizes = [8, 64], strides = [1, 1]} : vector<8x256xf32> to vector<8x64xf32>
    %97 = arith.mulf %96, %60 : vector<8x64xf32>
    %98 = vector.extract_strided_slice %95 {offsets = [0, 0], sizes = [8, 64], strides = [1, 1]} : vector<8x256xf32> to vector<8x64xf32>
    %99 = vector.extract_strided_slice %95 {offsets = [0, 128], sizes = [8, 64], strides = [1, 1]} : vector<8x256xf32> to vector<8x64xf32>
    %100 = arith.mulf %98, %99 : vector<8x64xf32>
    %101 = arith.addf %97, %100 : vector<8x64xf32>
    %102 = vector.extract_strided_slice %95 {offsets = [0, 192], sizes = [8, 64], strides = [1, 1]} : vector<8x256xf32> to vector<8x64xf32>
    %103 = math.tanh %101 : vector<8x64xf32>
    %104 = arith.mulf %102, %103 : vector<8x64xf32>
    %c2_i32 = arith.constant 2 : i32
    %cst_30 = arith.constant dense<0.000000e+00> : vector<8x64xf32>
    %105 = tpu.matmul %104, %3, %cst_30 {dimension_numbers = #tpu.dot_dimension_numbers<[1], [0], [0], [1], [0, 0, 1, 1], [], []>} : vector<8x64xf32>, vector<64x64xf32>, vector<8x64xf32> -> vector<8x64xf32>
    %cst_31 = arith.constant dense<0.000000e+00> : vector<8x64xf32>
    %106 = tpu.matmul %83, %4, %cst_31 {dimension_numbers = #tpu.dot_dimension_numbers<[1], [0], [0], [1], [0, 0, 1, 1], [], []>} : vector<8x16xf32>, vector<16x64xf32>, vector<8x64xf32> -> vector<8x64xf32>
    %107 = arith.addf %105, %106 : vector<8x64xf32>
    %108 = arith.addf %107, %5 : vector<8x64xf32>
    %109 = math.tanh %108 : vector<8x64xf32>
    %110 = arith.negf %108 : vector<8x64xf32>
    %111 = math.exp %110 : vector<8x64xf32>
    %cst_32 = arith.constant 1.000000e+00 : f32
    %112 = vector.broadcast %cst_32 : f32 to vector<8x64xf32>
    %113 = arith.addf %112, %111 : vector<8x64xf32>
    %114 = arith.divf %112, %113 : vector<8x64xf32>
    %115 = arith.select %12, %109, %114 : vector<8x64xi1>, vector<8x64xf32>
    %116 = vector.extract_strided_slice %115 {offsets = [0, 16], sizes = [8, 16], strides = [1, 1]} : vector<8x64xf32> to vector<8x16xf32>
    %117 = arith.mulf %116, %80 : vector<8x16xf32>
    %118 = vector.extract_strided_slice %115 {offsets = [0, 0], sizes = [8, 16], strides = [1, 1]} : vector<8x64xf32> to vector<8x16xf32>
    %119 = vector.extract_strided_slice %115 {offsets = [0, 32], sizes = [8, 16], strides = [1, 1]} : vector<8x64xf32> to vector<8x16xf32>
    %120 = arith.mulf %118, %119 : vector<8x16xf32>
    %121 = arith.addf %117, %120 : vector<8x16xf32>
    %122 = vector.extract_strided_slice %115 {offsets = [0, 48], sizes = [8, 16], strides = [1, 1]} : vector<8x64xf32> to vector<8x16xf32>
    %123 = math.tanh %121 : vector<8x16xf32>
    %124 = arith.mulf %122, %123 : vector<8x16xf32>
    %125 = arith.index_cast %c2_i32 : i32 to index
    %c0_33 = arith.constant 0 : index
    %c0_34 = arith.constant 0 : index
    %126 = vector.load %arg1[%125, %c0_33, %c0_34] : memref<8x8x256xf32, #tpu.memory_space<vmem>>, vector<1x8x256xf32>
    %127 = vector.shape_cast %126 : vector<1x8x256xf32> to vector<8x256xf32>
    %cst_35 = arith.constant dense<0.000000e+00> : vector<8x256xf32>
    %128 = tpu.matmul %124, %6, %cst_35 {dimension_numbers = #tpu.dot_dimension_numbers<[1], [0], [0], [1], [0, 0, 1, 1], [], []>} : vector<8x16xf32>, vector<16x256xf32>, vector<8x256xf32> -> vector<8x256xf32>
    %129 = arith.addf %127, %128 : vector<8x256xf32>
    %130 = math.tanh %129 : vector<8x256xf32>
    %131 = arith.negf %129 : vector<8x256xf32>
    %132 = math.exp %131 : vector<8x256xf32>
    %cst_36 = arith.constant 1.000000e+00 : f32
    %133 = vector.broadcast %cst_36 : f32 to vector<8x256xf32>
    %134 = arith.addf %133, %132 : vector<8x256xf32>
    %135 = arith.divf %133, %134 : vector<8x256xf32>
    %136 = arith.select %18, %130, %135 : vector<8x256xi1>, vector<8x256xf32>
    %137 = vector.extract_strided_slice %136 {offsets = [0, 64], sizes = [8, 64], strides = [1, 1]} : vector<8x256xf32> to vector<8x64xf32>
    %138 = arith.mulf %137, %101 : vector<8x64xf32>
    %139 = vector.extract_strided_slice %136 {offsets = [0, 0], sizes = [8, 64], strides = [1, 1]} : vector<8x256xf32> to vector<8x64xf32>
    %140 = vector.extract_strided_slice %136 {offsets = [0, 128], sizes = [8, 64], strides = [1, 1]} : vector<8x256xf32> to vector<8x64xf32>
    %141 = arith.mulf %139, %140 : vector<8x64xf32>
    %142 = arith.addf %138, %141 : vector<8x64xf32>
    %143 = vector.extract_strided_slice %136 {offsets = [0, 192], sizes = [8, 64], strides = [1, 1]} : vector<8x256xf32> to vector<8x64xf32>
    %144 = math.tanh %142 : vector<8x64xf32>
    %145 = arith.mulf %143, %144 : vector<8x64xf32>
    %c3_i32 = arith.constant 3 : i32
    %cst_37 = arith.constant dense<0.000000e+00> : vector<8x64xf32>
    %146 = tpu.matmul %145, %3, %cst_37 {dimension_numbers = #tpu.dot_dimension_numbers<[1], [0], [0], [1], [0, 0, 1, 1], [], []>} : vector<8x64xf32>, vector<64x64xf32>, vector<8x64xf32> -> vector<8x64xf32>
    %cst_38 = arith.constant dense<0.000000e+00> : vector<8x64xf32>
    %147 = tpu.matmul %124, %4, %cst_38 {dimension_numbers = #tpu.dot_dimension_numbers<[1], [0], [0], [1], [0, 0, 1, 1], [], []>} : vector<8x16xf32>, vector<16x64xf32>, vector<8x64xf32> -> vector<8x64xf32>
    %148 = arith.addf %146, %147 : vector<8x64xf32>
    %149 = arith.addf %148, %5 : vector<8x64xf32>
    %150 = math.tanh %149 : vector<8x64xf32>
    %151 = arith.negf %149 : vector<8x64xf32>
    %152 = math.exp %151 : vector<8x64xf32>
    %cst_39 = arith.constant 1.000000e+00 : f32
    %153 = vector.broadcast %cst_39 : f32 to vector<8x64xf32>
    %154 = arith.addf %153, %152 : vector<8x64xf32>
    %155 = arith.divf %153, %154 : vector<8x64xf32>
    %156 = arith.select %12, %150, %155 : vector<8x64xi1>, vector<8x64xf32>
    %157 = vector.extract_strided_slice %156 {offsets = [0, 16], sizes = [8, 16], strides = [1, 1]} : vector<8x64xf32> to vector<8x16xf32>
    %158 = arith.mulf %157, %121 : vector<8x16xf32>
    %159 = vector.extract_strided_slice %156 {offsets = [0, 0], sizes = [8, 16], strides = [1, 1]} : vector<8x64xf32> to vector<8x16xf32>
    %160 = vector.extract_strided_slice %156 {offsets = [0, 32], sizes = [8, 16], strides = [1, 1]} : vector<8x64xf32> to vector<8x16xf32>
    %161 = arith.mulf %159, %160 : vector<8x16xf32>
    %162 = arith.addf %158, %161 : vector<8x16xf32>
    %163 = vector.extract_strided_slice %156 {offsets = [0, 48], sizes = [8, 16], strides = [1, 1]} : vector<8x64xf32> to vector<8x16xf32>
    %164 = math.tanh %162 : vector<8x16xf32>
    %165 = arith.mulf %163, %164 : vector<8x16xf32>
    %166 = arith.index_cast %c3_i32 : i32 to index
    %c0_40 = arith.constant 0 : index
    %c0_41 = arith.constant 0 : index
    %167 = vector.load %arg1[%166, %c0_40, %c0_41] : memref<8x8x256xf32, #tpu.memory_space<vmem>>, vector<1x8x256xf32>
    %168 = vector.shape_cast %167 : vector<1x8x256xf32> to vector<8x256xf32>
    %cst_42 = arith.constant dense<0.000000e+00> : vector<8x256xf32>
    %169 = tpu.matmul %165, %6, %cst_42 {dimension_numbers = #tpu.dot_dimension_numbers<[1], [0], [0], [1], [0, 0, 1, 1], [], []>} : vector<8x16xf32>, vector<16x256xf32>, vector<8x256xf32> -> vector<8x256xf32>
    %170 = arith.addf %168, %169 : vector<8x256xf32>
    %171 = math.tanh %170 : vector<8x256xf32>
    %172 = arith.negf %170 : vector<8x256xf32>
    %173 = math.exp %172 : vector<8x256xf32>
    %cst_43 = arith.constant 1.000000e+00 : f32
    %174 = vector.broadcast %cst_43 : f32 to vector<8x256xf32>
    %175 = arith.addf %174, %173 : vector<8x256xf32>
    %176 = arith.divf %174, %175 : vector<8x256xf32>
    %177 = arith.select %18, %171, %176 : vector<8x256xi1>, vector<8x256xf32>
    %178 = vector.extract_strided_slice %177 {offsets = [0, 64], sizes = [8, 64], strides = [1, 1]} : vector<8x256xf32> to vector<8x64xf32>
    %179 = arith.mulf %178, %142 : vector<8x64xf32>
    %180 = vector.extract_strided_slice %177 {offsets = [0, 0], sizes = [8, 64], strides = [1, 1]} : vector<8x256xf32> to vector<8x64xf32>
    %181 = vector.extract_strided_slice %177 {offsets = [0, 128], sizes = [8, 64], strides = [1, 1]} : vector<8x256xf32> to vector<8x64xf32>
    %182 = arith.mulf %180, %181 : vector<8x64xf32>
    %183 = arith.addf %179, %182 : vector<8x64xf32>
    %184 = vector.extract_strided_slice %177 {offsets = [0, 192], sizes = [8, 64], strides = [1, 1]} : vector<8x256xf32> to vector<8x64xf32>
    %185 = math.tanh %183 : vector<8x64xf32>
    %186 = arith.mulf %184, %185 : vector<8x64xf32>
    %c4_i32 = arith.constant 4 : i32
    %cst_44 = arith.constant dense<0.000000e+00> : vector<8x64xf32>
    %187 = tpu.matmul %186, %3, %cst_44 {dimension_numbers = #tpu.dot_dimension_numbers<[1], [0], [0], [1], [0, 0, 1, 1], [], []>} : vector<8x64xf32>, vector<64x64xf32>, vector<8x64xf32> -> vector<8x64xf32>
    %cst_45 = arith.constant dense<0.000000e+00> : vector<8x64xf32>
    %188 = tpu.matmul %165, %4, %cst_45 {dimension_numbers = #tpu.dot_dimension_numbers<[1], [0], [0], [1], [0, 0, 1, 1], [], []>} : vector<8x16xf32>, vector<16x64xf32>, vector<8x64xf32> -> vector<8x64xf32>
    %189 = arith.addf %187, %188 : vector<8x64xf32>
    %190 = arith.addf %189, %5 : vector<8x64xf32>
    %191 = math.tanh %190 : vector<8x64xf32>
    %192 = arith.negf %190 : vector<8x64xf32>
    %193 = math.exp %192 : vector<8x64xf32>
    %cst_46 = arith.constant 1.000000e+00 : f32
    %194 = vector.broadcast %cst_46 : f32 to vector<8x64xf32>
    %195 = arith.addf %194, %193 : vector<8x64xf32>
    %196 = arith.divf %194, %195 : vector<8x64xf32>
    %197 = arith.select %12, %191, %196 : vector<8x64xi1>, vector<8x64xf32>
    %198 = vector.extract_strided_slice %197 {offsets = [0, 16], sizes = [8, 16], strides = [1, 1]} : vector<8x64xf32> to vector<8x16xf32>
    %199 = arith.mulf %198, %162 : vector<8x16xf32>
    %200 = vector.extract_strided_slice %197 {offsets = [0, 0], sizes = [8, 16], strides = [1, 1]} : vector<8x64xf32> to vector<8x16xf32>
    %201 = vector.extract_strided_slice %197 {offsets = [0, 32], sizes = [8, 16], strides = [1, 1]} : vector<8x64xf32> to vector<8x16xf32>
    %202 = arith.mulf %200, %201 : vector<8x16xf32>
    %203 = arith.addf %199, %202 : vector<8x16xf32>
    %204 = vector.extract_strided_slice %197 {offsets = [0, 48], sizes = [8, 16], strides = [1, 1]} : vector<8x64xf32> to vector<8x16xf32>
    %205 = math.tanh %203 : vector<8x16xf32>
    %206 = arith.mulf %204, %205 : vector<8x16xf32>
    %207 = arith.index_cast %c4_i32 : i32 to index
    %c0_47 = arith.constant 0 : index
    %c0_48 = arith.constant 0 : index
    %208 = vector.load %arg1[%207, %c0_47, %c0_48] : memref<8x8x256xf32, #tpu.memory_space<vmem>>, vector<1x8x256xf32>
    %209 = vector.shape_cast %208 : vector<1x8x256xf32> to vector<8x256xf32>
    %cst_49 = arith.constant dense<0.000000e+00> : vector<8x256xf32>
    %210 = tpu.matmul %206, %6, %cst_49 {dimension_numbers = #tpu.dot_dimension_numbers<[1], [0], [0], [1], [0, 0, 1, 1], [], []>} : vector<8x16xf32>, vector<16x256xf32>, vector<8x256xf32> -> vector<8x256xf32>
    %211 = arith.addf %209, %210 : vector<8x256xf32>
    %212 = math.tanh %211 : vector<8x256xf32>
    %213 = arith.negf %211 : vector<8x256xf32>
    %214 = math.exp %213 : vector<8x256xf32>
    %cst_50 = arith.constant 1.000000e+00 : f32
    %215 = vector.broadcast %cst_50 : f32 to vector<8x256xf32>
    %216 = arith.addf %215, %214 : vector<8x256xf32>
    %217 = arith.divf %215, %216 : vector<8x256xf32>
    %218 = arith.select %18, %212, %217 : vector<8x256xi1>, vector<8x256xf32>
    %219 = vector.extract_strided_slice %218 {offsets = [0, 64], sizes = [8, 64], strides = [1, 1]} : vector<8x256xf32> to vector<8x64xf32>
    %220 = arith.mulf %219, %183 : vector<8x64xf32>
    %221 = vector.extract_strided_slice %218 {offsets = [0, 0], sizes = [8, 64], strides = [1, 1]} : vector<8x256xf32> to vector<8x64xf32>
    %222 = vector.extract_strided_slice %218 {offsets = [0, 128], sizes = [8, 64], strides = [1, 1]} : vector<8x256xf32> to vector<8x64xf32>
    %223 = arith.mulf %221, %222 : vector<8x64xf32>
    %224 = arith.addf %220, %223 : vector<8x64xf32>
    %225 = vector.extract_strided_slice %218 {offsets = [0, 192], sizes = [8, 64], strides = [1, 1]} : vector<8x256xf32> to vector<8x64xf32>
    %226 = math.tanh %224 : vector<8x64xf32>
    %227 = arith.mulf %225, %226 : vector<8x64xf32>
    %c5_i32 = arith.constant 5 : i32
    %cst_51 = arith.constant dense<0.000000e+00> : vector<8x64xf32>
    %228 = tpu.matmul %227, %3, %cst_51 {dimension_numbers = #tpu.dot_dimension_numbers<[1], [0], [0], [1], [0, 0, 1, 1], [], []>} : vector<8x64xf32>, vector<64x64xf32>, vector<8x64xf32> -> vector<8x64xf32>
    %cst_52 = arith.constant dense<0.000000e+00> : vector<8x64xf32>
    %229 = tpu.matmul %206, %4, %cst_52 {dimension_numbers = #tpu.dot_dimension_numbers<[1], [0], [0], [1], [0, 0, 1, 1], [], []>} : vector<8x16xf32>, vector<16x64xf32>, vector<8x64xf32> -> vector<8x64xf32>
    %230 = arith.addf %228, %229 : vector<8x64xf32>
    %231 = arith.addf %230, %5 : vector<8x64xf32>
    %232 = math.tanh %231 : vector<8x64xf32>
    %233 = arith.negf %231 : vector<8x64xf32>
    %234 = math.exp %233 : vector<8x64xf32>
    %cst_53 = arith.constant 1.000000e+00 : f32
    %235 = vector.broadcast %cst_53 : f32 to vector<8x64xf32>
    %236 = arith.addf %235, %234 : vector<8x64xf32>
    %237 = arith.divf %235, %236 : vector<8x64xf32>
    %238 = arith.select %12, %232, %237 : vector<8x64xi1>, vector<8x64xf32>
    %239 = vector.extract_strided_slice %238 {offsets = [0, 16], sizes = [8, 16], strides = [1, 1]} : vector<8x64xf32> to vector<8x16xf32>
    %240 = arith.mulf %239, %203 : vector<8x16xf32>
    %241 = vector.extract_strided_slice %238 {offsets = [0, 0], sizes = [8, 16], strides = [1, 1]} : vector<8x64xf32> to vector<8x16xf32>
    %242 = vector.extract_strided_slice %238 {offsets = [0, 32], sizes = [8, 16], strides = [1, 1]} : vector<8x64xf32> to vector<8x16xf32>
    %243 = arith.mulf %241, %242 : vector<8x16xf32>
    %244 = arith.addf %240, %243 : vector<8x16xf32>
    %245 = vector.extract_strided_slice %238 {offsets = [0, 48], sizes = [8, 16], strides = [1, 1]} : vector<8x64xf32> to vector<8x16xf32>
    %246 = math.tanh %244 : vector<8x16xf32>
    %247 = arith.mulf %245, %246 : vector<8x16xf32>
    %248 = arith.index_cast %c5_i32 : i32 to index
    %c0_54 = arith.constant 0 : index
    %c0_55 = arith.constant 0 : index
    %249 = vector.load %arg1[%248, %c0_54, %c0_55] : memref<8x8x256xf32, #tpu.memory_space<vmem>>, vector<1x8x256xf32>
    %250 = vector.shape_cast %249 : vector<1x8x256xf32> to vector<8x256xf32>
    %cst_56 = arith.constant dense<0.000000e+00> : vector<8x256xf32>
    %251 = tpu.matmul %247, %6, %cst_56 {dimension_numbers = #tpu.dot_dimension_numbers<[1], [0], [0], [1], [0, 0, 1, 1], [], []>} : vector<8x16xf32>, vector<16x256xf32>, vector<8x256xf32> -> vector<8x256xf32>
    %252 = arith.addf %250, %251 : vector<8x256xf32>
    %253 = math.tanh %252 : vector<8x256xf32>
    %254 = arith.negf %252 : vector<8x256xf32>
    %255 = math.exp %254 : vector<8x256xf32>
    %cst_57 = arith.constant 1.000000e+00 : f32
    %256 = vector.broadcast %cst_57 : f32 to vector<8x256xf32>
    %257 = arith.addf %256, %255 : vector<8x256xf32>
    %258 = arith.divf %256, %257 : vector<8x256xf32>
    %259 = arith.select %18, %253, %258 : vector<8x256xi1>, vector<8x256xf32>
    %260 = vector.extract_strided_slice %259 {offsets = [0, 64], sizes = [8, 64], strides = [1, 1]} : vector<8x256xf32> to vector<8x64xf32>
    %261 = arith.mulf %260, %224 : vector<8x64xf32>
    %262 = vector.extract_strided_slice %259 {offsets = [0, 0], sizes = [8, 64], strides = [1, 1]} : vector<8x256xf32> to vector<8x64xf32>
    %263 = vector.extract_strided_slice %259 {offsets = [0, 128], sizes = [8, 64], strides = [1, 1]} : vector<8x256xf32> to vector<8x64xf32>
    %264 = arith.mulf %262, %263 : vector<8x64xf32>
    %265 = arith.addf %261, %264 : vector<8x64xf32>
    %266 = vector.extract_strided_slice %259 {offsets = [0, 192], sizes = [8, 64], strides = [1, 1]} : vector<8x256xf32> to vector<8x64xf32>
    %267 = math.tanh %265 : vector<8x64xf32>
    %268 = arith.mulf %266, %267 : vector<8x64xf32>
    %c6_i32 = arith.constant 6 : i32
    %cst_58 = arith.constant dense<0.000000e+00> : vector<8x64xf32>
    %269 = tpu.matmul %268, %3, %cst_58 {dimension_numbers = #tpu.dot_dimension_numbers<[1], [0], [0], [1], [0, 0, 1, 1], [], []>} : vector<8x64xf32>, vector<64x64xf32>, vector<8x64xf32> -> vector<8x64xf32>
    %cst_59 = arith.constant dense<0.000000e+00> : vector<8x64xf32>
    %270 = tpu.matmul %247, %4, %cst_59 {dimension_numbers = #tpu.dot_dimension_numbers<[1], [0], [0], [1], [0, 0, 1, 1], [], []>} : vector<8x16xf32>, vector<16x64xf32>, vector<8x64xf32> -> vector<8x64xf32>
    %271 = arith.addf %269, %270 : vector<8x64xf32>
    %272 = arith.addf %271, %5 : vector<8x64xf32>
    %273 = math.tanh %272 : vector<8x64xf32>
    %274 = arith.negf %272 : vector<8x64xf32>
    %275 = math.exp %274 : vector<8x64xf32>
    %cst_60 = arith.constant 1.000000e+00 : f32
    %276 = vector.broadcast %cst_60 : f32 to vector<8x64xf32>
    %277 = arith.addf %276, %275 : vector<8x64xf32>
    %278 = arith.divf %276, %277 : vector<8x64xf32>
    %279 = arith.select %12, %273, %278 : vector<8x64xi1>, vector<8x64xf32>
    %280 = vector.extract_strided_slice %279 {offsets = [0, 16], sizes = [8, 16], strides = [1, 1]} : vector<8x64xf32> to vector<8x16xf32>
    %281 = arith.mulf %280, %244 : vector<8x16xf32>
    %282 = vector.extract_strided_slice %279 {offsets = [0, 0], sizes = [8, 16], strides = [1, 1]} : vector<8x64xf32> to vector<8x16xf32>
    %283 = vector.extract_strided_slice %279 {offsets = [0, 32], sizes = [8, 16], strides = [1, 1]} : vector<8x64xf32> to vector<8x16xf32>
    %284 = arith.mulf %282, %283 : vector<8x16xf32>
    %285 = arith.addf %281, %284 : vector<8x16xf32>
    %286 = vector.extract_strided_slice %279 {offsets = [0, 48], sizes = [8, 16], strides = [1, 1]} : vector<8x64xf32> to vector<8x16xf32>
    %287 = math.tanh %285 : vector<8x16xf32>
    %288 = arith.mulf %286, %287 : vector<8x16xf32>
    %289 = arith.index_cast %c6_i32 : i32 to index
    %c0_61 = arith.constant 0 : index
    %c0_62 = arith.constant 0 : index
    %290 = vector.load %arg1[%289, %c0_61, %c0_62] : memref<8x8x256xf32, #tpu.memory_space<vmem>>, vector<1x8x256xf32>
    %291 = vector.shape_cast %290 : vector<1x8x256xf32> to vector<8x256xf32>
    %cst_63 = arith.constant dense<0.000000e+00> : vector<8x256xf32>
    %292 = tpu.matmul %288, %6, %cst_63 {dimension_numbers = #tpu.dot_dimension_numbers<[1], [0], [0], [1], [0, 0, 1, 1], [], []>} : vector<8x16xf32>, vector<16x256xf32>, vector<8x256xf32> -> vector<8x256xf32>
    %293 = arith.addf %291, %292 : vector<8x256xf32>
    %294 = math.tanh %293 : vector<8x256xf32>
    %295 = arith.negf %293 : vector<8x256xf32>
    %296 = math.exp %295 : vector<8x256xf32>
    %cst_64 = arith.constant 1.000000e+00 : f32
    %297 = vector.broadcast %cst_64 : f32 to vector<8x256xf32>
    %298 = arith.addf %297, %296 : vector<8x256xf32>
    %299 = arith.divf %297, %298 : vector<8x256xf32>
    %300 = arith.select %18, %294, %299 : vector<8x256xi1>, vector<8x256xf32>
    %301 = vector.extract_strided_slice %300 {offsets = [0, 64], sizes = [8, 64], strides = [1, 1]} : vector<8x256xf32> to vector<8x64xf32>
    %302 = arith.mulf %301, %265 : vector<8x64xf32>
    %303 = vector.extract_strided_slice %300 {offsets = [0, 0], sizes = [8, 64], strides = [1, 1]} : vector<8x256xf32> to vector<8x64xf32>
    %304 = vector.extract_strided_slice %300 {offsets = [0, 128], sizes = [8, 64], strides = [1, 1]} : vector<8x256xf32> to vector<8x64xf32>
    %305 = arith.mulf %303, %304 : vector<8x64xf32>
    %306 = arith.addf %302, %305 : vector<8x64xf32>
    %307 = vector.extract_strided_slice %300 {offsets = [0, 192], sizes = [8, 64], strides = [1, 1]} : vector<8x256xf32> to vector<8x64xf32>
    %308 = math.tanh %306 : vector<8x64xf32>
    %309 = arith.mulf %307, %308 : vector<8x64xf32>
    %c7_i32 = arith.constant 7 : i32
    %cst_65 = arith.constant dense<0.000000e+00> : vector<8x64xf32>
    %310 = tpu.matmul %309, %3, %cst_65 {dimension_numbers = #tpu.dot_dimension_numbers<[1], [0], [0], [1], [0, 0, 1, 1], [], []>} : vector<8x64xf32>, vector<64x64xf32>, vector<8x64xf32> -> vector<8x64xf32>
    %cst_66 = arith.constant dense<0.000000e+00> : vector<8x64xf32>
    %311 = tpu.matmul %288, %4, %cst_66 {dimension_numbers = #tpu.dot_dimension_numbers<[1], [0], [0], [1], [0, 0, 1, 1], [], []>} : vector<8x16xf32>, vector<16x64xf32>, vector<8x64xf32> -> vector<8x64xf32>
    %312 = arith.addf %310, %311 : vector<8x64xf32>
    %313 = arith.addf %312, %5 : vector<8x64xf32>
    %314 = math.tanh %313 : vector<8x64xf32>
    %315 = arith.negf %313 : vector<8x64xf32>
    %316 = math.exp %315 : vector<8x64xf32>
    %cst_67 = arith.constant 1.000000e+00 : f32
    %317 = vector.broadcast %cst_67 : f32 to vector<8x64xf32>
    %318 = arith.addf %317, %316 : vector<8x64xf32>
    %319 = arith.divf %317, %318 : vector<8x64xf32>
    %320 = arith.select %12, %314, %319 : vector<8x64xi1>, vector<8x64xf32>
    %321 = vector.extract_strided_slice %320 {offsets = [0, 16], sizes = [8, 16], strides = [1, 1]} : vector<8x64xf32> to vector<8x16xf32>
    %322 = arith.mulf %321, %285 : vector<8x16xf32>
    %323 = vector.extract_strided_slice %320 {offsets = [0, 0], sizes = [8, 16], strides = [1, 1]} : vector<8x64xf32> to vector<8x16xf32>
    %324 = vector.extract_strided_slice %320 {offsets = [0, 32], sizes = [8, 16], strides = [1, 1]} : vector<8x64xf32> to vector<8x16xf32>
    %325 = arith.mulf %323, %324 : vector<8x16xf32>
    %326 = arith.addf %322, %325 : vector<8x16xf32>
    %327 = vector.extract_strided_slice %320 {offsets = [0, 48], sizes = [8, 16], strides = [1, 1]} : vector<8x64xf32> to vector<8x16xf32>
    %328 = math.tanh %326 : vector<8x16xf32>
    %329 = arith.mulf %327, %328 : vector<8x16xf32>
    %330 = arith.index_cast %c7_i32 : i32 to index
    %c0_68 = arith.constant 0 : index
    %c0_69 = arith.constant 0 : index
    %331 = vector.load %arg1[%330, %c0_68, %c0_69] : memref<8x8x256xf32, #tpu.memory_space<vmem>>, vector<1x8x256xf32>
    %332 = vector.shape_cast %331 : vector<1x8x256xf32> to vector<8x256xf32>
    %cst_70 = arith.constant dense<0.000000e+00> : vector<8x256xf32>
    %333 = tpu.matmul %329, %6, %cst_70 {dimension_numbers = #tpu.dot_dimension_numbers<[1], [0], [0], [1], [0, 0, 1, 1], [], []>} : vector<8x16xf32>, vector<16x256xf32>, vector<8x256xf32> -> vector<8x256xf32>
    %334 = arith.addf %332, %333 : vector<8x256xf32>
    %335 = math.tanh %334 : vector<8x256xf32>
    %336 = arith.negf %334 : vector<8x256xf32>
    %337 = math.exp %336 : vector<8x256xf32>
    %cst_71 = arith.constant 1.000000e+00 : f32
    %338 = vector.broadcast %cst_71 : f32 to vector<8x256xf32>
    %339 = arith.addf %338, %337 : vector<8x256xf32>
    %340 = arith.divf %338, %339 : vector<8x256xf32>
    %341 = arith.select %18, %335, %340 : vector<8x256xi1>, vector<8x256xf32>
    %342 = vector.extract_strided_slice %341 {offsets = [0, 64], sizes = [8, 64], strides = [1, 1]} : vector<8x256xf32> to vector<8x64xf32>
    %343 = arith.mulf %342, %306 : vector<8x64xf32>
    %344 = vector.extract_strided_slice %341 {offsets = [0, 0], sizes = [8, 64], strides = [1, 1]} : vector<8x256xf32> to vector<8x64xf32>
    %345 = vector.extract_strided_slice %341 {offsets = [0, 128], sizes = [8, 64], strides = [1, 1]} : vector<8x256xf32> to vector<8x64xf32>
    %346 = arith.mulf %344, %345 : vector<8x64xf32>
    %347 = arith.addf %343, %346 : vector<8x64xf32>
    %348 = vector.extract_strided_slice %341 {offsets = [0, 192], sizes = [8, 64], strides = [1, 1]} : vector<8x256xf32> to vector<8x64xf32>
    %349 = math.tanh %347 : vector<8x64xf32>
    %350 = arith.mulf %348, %349 : vector<8x64xf32>
    %c8_i32 = arith.constant 8 : i32
    %c0_72 = arith.constant 0 : index
    %c0_73 = arith.constant 0 : index
    %351 = vector.load %arg14[%c0_72, %c0_73] : memref<8x64xf32, #tpu.memory_space<vmem>>, vector<8x64xf32>
    tpu.vector_store %arg14[%c0_72, %c0_73], %350 {strides = array<i32>} : memref<8x64xf32, #tpu.memory_space<vmem>>, vector<8x64xf32>,
    %c0_74 = arith.constant 0 : index
    %c0_75 = arith.constant 0 : index
    %352 = vector.load %arg15[%c0_74, %c0_75] : memref<8x16xf32, #tpu.memory_space<vmem>>, vector<8x16xf32>
    tpu.vector_store %arg15[%c0_74, %c0_75], %329 {strides = array<i32>} : memref<8x16xf32, #tpu.memory_space<vmem>>, vector<8x16xf32>,
    %c0_76 = arith.constant 0 : index
    %c0_77 = arith.constant 0 : index
    %353 = vector.load %arg16[%c0_76, %c0_77] : memref<8x64xf32, #tpu.memory_space<vmem>>, vector<8x64xf32>
    tpu.vector_store %arg16[%c0_76, %c0_77], %347 {strides = array<i32>} : memref<8x64xf32, #tpu.memory_space<vmem>>, vector<8x64xf32>,
    %c0_78 = arith.constant 0 : index
    %c0_79 = arith.constant 0 : index
    %354 = vector.load %arg17[%c0_78, %c0_79] : memref<8x16xf32, #tpu.memory_space<vmem>>, vector<8x16xf32>
    tpu.vector_store %arg17[%c0_78, %c0_79], %326 {strides = array<i32>} : memref<8x16xf32, #tpu.memory_space<vmem>>, vector<8x16xf32>,
    %c0_i32_80 = arith.constant 0 : i32
    %355 = arith.cmpi eq, %arg0, %c0_i32_80 : i32
    %356 = arith.extui %355 : i1 to i32
    %c0_i32_81 = arith.constant 0 : i32
    %357 = arith.cmpi ne, %356, %c0_i32_81 : i32
    scf.if %357 {
      %c0_82 = arith.constant 0 : index
      %c0_83 = arith.constant 0 : index
      %358 = vector.load %arg10[%c0_82, %c0_83] : memref<8x64xf32, #tpu.memory_space<vmem>>, vector<8x64xf32>
      tpu.vector_store %arg10[%c0_82, %c0_83], %350 {strides = array<i32>} : memref<8x64xf32, #tpu.memory_space<vmem>>, vector<8x64xf32>,
      %c0_84 = arith.constant 0 : index
      %c0_85 = arith.constant 0 : index
      %359 = vector.load %arg11[%c0_84, %c0_85] : memref<8x16xf32, #tpu.memory_space<vmem>>, vector<8x16xf32>
      tpu.vector_store %arg11[%c0_84, %c0_85], %329 {strides = array<i32>} : memref<8x16xf32, #tpu.memory_space<vmem>>, vector<8x16xf32>,
      %c0_86 = arith.constant 0 : index
      %c0_87 = arith.constant 0 : index
      %360 = vector.load %arg12[%c0_86, %c0_87] : memref<8x64xf32, #tpu.memory_space<vmem>>, vector<8x64xf32>
      tpu.vector_store %arg12[%c0_86, %c0_87], %347 {strides = array<i32>} : memref<8x64xf32, #tpu.memory_space<vmem>>, vector<8x64xf32>,
      %c0_88 = arith.constant 0 : index
      %c0_89 = arith.constant 0 : index
      %361 = vector.load %arg13[%c0_88, %c0_89] : memref<8x16xf32, #tpu.memory_space<vmem>>, vector<8x16xf32>
      tpu.vector_store %arg13[%c0_88, %c0_89], %326 {strides = array<i32>} : memref<8x16xf32, #tpu.memory_space<vmem>>, vector<8x16xf32>,
    } else {
    }
    return
  }
  func.func @transform_0(%arg0: i32) -> (i32, i32, i32) {
    %c0_i32 = arith.constant 0 : i32
    %c0_i32_0 = arith.constant 0 : i32
    %c0_i32_1 = arith.constant 0 : i32
    return %arg0, %c0_i32, %c0_i32_0 : i32, i32, i32
  }
  func.func @transform_1(%arg0: i32) -> (i32, i32) {
    %c0_i32 = arith.constant 0 : i32
    %c0_i32_0 = arith.constant 0 : i32
    %c0_i32_1 = arith.constant 0 : i32
    return %c0_i32, %c0_i32_0 : i32, i32
  }
  func.func @transform_2(%arg0: i32) -> (i32, i32) {
    %c0_i32 = arith.constant 0 : i32
    %c0_i32_0 = arith.constant 0 : i32
    %c0_i32_1 = arith.constant 0 : i32
    return %c0_i32, %c0_i32_0 : i32, i32
  }
  func.func @transform_3(%arg0: i32) -> (i32, i32) {
    %c0_i32 = arith.constant 0 : i32
    %c0_i32_0 = arith.constant 0 : i32
    %c0_i32_1 = arith.constant 0 : i32
    return %c0_i32, %c0_i32_0 : i32, i32
  }
  func.func @transform_4(%arg0: i32) -> (i32, i32) {
    %c0_i32 = arith.constant 0 : i32
    %c0_i32_0 = arith.constant 0 : i32
    %c0_i32_1 = arith.constant 0 : i32
    return %c0_i32, %c0_i32_0 : i32, i32
  }
  func.func @transform_5(%arg0: i32) -> (i32, i32) {
    %c0_i32 = arith.constant 0 : i32
    %c0_i32_0 = arith.constant 0 : i32
    %c0_i32_1 = arith.constant 0 : i32
    return %c0_i32, %c0_i32_0 : i32, i32
  }
  func.func @transform_6(%arg0: i32) -> (i32, i32) {
    %c0_i32 = arith.constant 0 : i32
    %c0_i32_0 = arith.constant 0 : i32
    %c0_i32_1 = arith.constant 0 : i32
    return %c0_i32, %c0_i32_0 : i32, i32
  }
  func.func @transform_7(%arg0: i32) -> (i32, i32) {
    %c0_i32 = arith.constant 0 : i32
    %c0_i32_0 = arith.constant 0 : i32
    %c0_i32_1 = arith.constant 0 : i32
    return %c0_i32, %c0_i32_0 : i32, i32
  }
  func.func @transform_8(%arg0: i32) -> (i32, i32) {
    %c0_i32 = arith.constant 0 : i32
    %c0_i32_0 = arith.constant 0 : i32
    %c0_i32_1 = arith.constant 0 : i32
    return %c0_i32, %c0_i32_0 : i32, i32
  }
  func.func @transform_9(%arg0: i32) -> (i32, i32) {
    %c0_i32 = arith.constant 0 : i32
    %c0_i32_0 = arith.constant 0 : i32
    %c0_i32_1 = arith.constant 0 : i32
    return %c0_i32, %c0_i32_0 : i32, i32
  }
  func.func @transform_10(%arg0: i32) -> (i32, i32) {
    %c0_i32 = arith.constant 0 : i32
    %c0_i32_0 = arith.constant 0 : i32
    %c0_i32_1 = arith.constant 0 : i32
    return %c0_i32, %c0_i32_0 : i32, i32
  }
  func.func @transform_11(%arg0: i32) -> (i32, i32) {
    %c0_i32 = arith.constant 0 : i32
    %c0_i32_0 = arith.constant 0 : i32
    %c0_i32_1 = arith.constant 0 : i32
    return %c0_i32, %c0_i32_0 : i32, i32
  }
  func.func @transform_12(%arg0: i32) -> (i32, i32) {
    %c0_i32 = arith.constant 0 : i32
    %c0_i32_0 = arith.constant 0 : i32
    %c0_i32_1 = arith.constant 0 : i32
    return %c0_i32, %c0_i32_0 : i32, i32
  }
}

</mosaic_0001>

<bundles_post_ra>
// kernel: tpu_custom_call.1
= control target key start
LH: loop header
LB: loop body
LE: loop exit
PB: predicated region body
PF: predicated region fallthrough
CT: control target
= control target key end

     0   :  { %18 = vsyncpa [#allocation7], 0  ;;  %s4004_s0 = inlined_call_operand.hbm [shape: f32[8,8,256], index: 0, kind: input, shape index: {}]   ;;  %s4005_s1 = inlined_call_operand.hbm [shape: f32[8,64], index: 1, kind: input, shape index: {}]   ;;  %s4006_s2 = inlined_call_operand.hbm [shape: f32[8,16], index: 2, kind: input, shape index: {}]   ;;  %s4007_s3 = inlined_call_operand.hbm [shape: f32[8,64], index: 3, kind: input, shape index: {}]   ;;  %s4008_s4 = inlined_call_operand.hbm [shape: f32[8,16], index: 4, kind: input, shape index: {}]   ;;  %s4009_s5 = inlined_call_operand.hbm [shape: f32[64,64], index: 5, kind: input, shape index: {}]   ;;  %s4010_s6 = inlined_call_operand.vmem [shape: f32[16,64], index: 6, kind: input, shape index: {}]   ;;  %s4011_s7 = inlined_call_operand.vmem [shape: f32[8,64], index: 7, kind: input, shape index: {}]   ;;  %s4012_s8 = inlined_call_operand.hbm [shape: f32[16,256], index: 8, kind: input, shape index: {}]   ;;  %s4013_s9 = inlined_call_operand.hbm [shape: f32[8,64], index: 9, kind: output, shape index: {0}]   ;;  %s4014_s10 = inlined_call_operand.hbm [shape: f32[8,16], index: 10, kind: output, shape index: {1}]   ;;  %s4015_s11 = inlined_call_operand.hbm [shape: f32[8,64], index: 11, kind: output, shape index: {2}]   ;;  %s4016_s12 = inlined_call_operand.hbm [shape: f32[8,16], index: 12, kind: output, shape index: {3}]  }
   0x1   :  { %19 = vsyncpa [#allocation10], 0 }
   0x2   :  { %20 = vsyncpa [#allocation13], 0 }
   0x3   :  { %21 = vsyncpa [#allocation16], 0 }
   0x4   :  { %22 = vsyncpa [#allocation8], 0 }
   0x5   :  { %23 = vsyncpa [#allocation20], 0 }
   0x6   :  { %24 = vsyncpa [#allocation23], 0  ;;  %s3424_s21 = smov [#allocation9]   ;;  %s3425_s23 = smov [#allocation12]  }
   0x7   :  { %s43_s22 = sshll.u32 %s3424_s21, 4  ;;  %s63_s24 = sshll.u32 %s3425_s23, 4  ;;  %s44_s22 = int_to_ptr.vmem [resolvable:$true] %s43_s22  ;;  %s64_s24 = int_to_ptr.vmem [resolvable:$true] %s63_s24 }
   0x8   :  { %s3168_s27 = scalar_lea.hbm %s4005_s1, 128 }
   0x9   :  { %p3169_p0 = scmp.ne.s32.totalorder %s4005_s1, %s3168_s27  ;;  %p3172_p1 = scmp.lt.u32.totalorder %s3168_s27, %s4005_s1 }
   0xb   :  { %p3174_p2 = pnand %p3172_p1, %p3169_p0 }
   0xd   :  { %3177 = shalt.err (!%p3174_p2)
}
   0xe   :  { %s3178_s14 = scalar_lea.vmem %s44_s22, 128  ;;  %p3183_p4 = scmp.lt.s32.totalorder %s44_s22, %s44_s22 }
   0xf   :  { %p3179_p3 = scmp.ne.s32.totalorder %s44_s22, %s3178_s14  ;;  %p3184_p5 = scmp.lt.s32.totalorder %s3178_s14, %s3178_s14 }
  0x11   :  { %p3185_p6 = por %p3184_p5, %p3183_p4 }
  0x13   :  { %p3186_p7 = pnand %p3185_p6, %p3179_p3 }
  0x15   :  { %3189 = shalt.err (!%p3186_p7)
}
  0x16   :  { %46 = dma.hbm_to_vmem [thread:$0]  %s4005_s1, 128, %s44_s22, [#allocation10]  }
  0x17   :  { %s3190_s19 = scalar_lea.hbm %s4007_s3, 128 }
  0x18   :  { %p3191_p8 = scmp.ne.s32.totalorder %s4007_s3, %s3190_s19  ;;  %p3194_p9 = scmp.lt.u32.totalorder %s3190_s19, %s4007_s3 }
  0x1a   :  { %p3196_p10 = pnand %p3194_p9, %p3191_p8 }
  0x1c   :  { %3199 = shalt.err (!%p3196_p10)
}
  0x1d   :  { %s3200_s26 = scalar_lea.vmem %s64_s24, 128  ;;  %p3205_p12 = scmp.lt.s32.totalorder %s64_s24, %s64_s24 }
  0x1e   :  { %p3201_p11 = scmp.ne.s32.totalorder %s64_s24, %s3200_s26  ;;  %p3206_p13 = scmp.lt.s32.totalorder %s3200_s26, %s3200_s26 }
  0x20   :  { %p3207_p0 = por %p3206_p13, %p3205_p12 }
  0x22   :  { %p3208_p1 = pnand %p3207_p0, %p3201_p11 }
  0x24   :  { %3211 = shalt.err (!%p3208_p1)
}
  0x25   :  { %66 = dma.hbm_to_vmem [thread:$0]  %s4007_s3, 128, %s64_s24, [#allocation13]  }
  0x26   :  { %s3426_s27 = smov [#allocation15]   ;;  %s3212_s13 = scalar_lea.hbm %s4009_s5, 1024 }
  0x27   :  { %s82_s28 = sshll.u32 %s3426_s27, 4  ;;  %p3213_p2 = scmp.ne.s32.totalorder %s4009_s5, %s3212_s13  ;;  %s83_s28 = int_to_ptr.vmem [resolvable:$true] %s82_s28 }
  0x28   :  { %p3216_p3 = scmp.lt.u32.totalorder %s3212_s13, %s4009_s5 }
  0x2a   :  { %p3218_p4 = pnand %p3216_p3, %p3213_p2 }
  0x2c   :  { %3221 = shalt.err (!%p3218_p4)
}
  0x2d   :  { %s3222_s18 = scalar_lea.vmem %s83_s28, 1024  ;;  %p3227_p6 = scmp.lt.s32.totalorder %s83_s28, %s83_s28 }
  0x2e   :  { %p3223_p5 = scmp.ne.s32.totalorder %s83_s28, %s3222_s18  ;;  %p3228_p7 = scmp.lt.s32.totalorder %s3222_s18, %s3222_s18 }
  0x30   :  { %p3229_p8 = por %p3228_p7, %p3227_p6 }
  0x32   :  { %p3230_p9 = pnand %p3229_p8, %p3223_p5 }
  0x34   :  { %3233 = shalt.err (!%p3230_p9)
}
  0x35   :  { %s3427_s3 = smov 128   ;;  %s3428_s24 = smov 8  }
  0x36   :  { %88 = dma.hbm_to_vmem [thread:$0]  %s4009_s5, 1024, %s83_s28, [#allocation16], %s3427_s3, %s3427_s3, %s3428_s24  }
  0x37   :  { %s3429_s21 = smov [#allocation6]   ;;  %s3234_s1 = scalar_lea.hbm %s4004_s0, 2048 }
  0x38   :  { %s30_s23 = sshll.u32 %s3429_s21, 4  ;;  %p3235_p10 = scmp.ne.s32.totalorder %s4004_s0, %s3234_s1  ;;  %s31_s23 = int_to_ptr.vmem [resolvable:$true] %s30_s23 }
  0x39   :  { %p3238_p11 = scmp.lt.u32.totalorder %s3234_s1, %s4004_s0 }
  0x3b   :  { %p3240_p12 = pnand %p3238_p11, %p3235_p10 }
  0x3d   :  { %3243 = shalt.err (!%p3240_p12)
}
  0x3e   :  { %s3244_s13 = scalar_lea.vmem %s31_s23, 2048  ;;  %p3249_p0 = scmp.lt.s32.totalorder %s31_s23, %s31_s23 }
  0x3f   :  { %p3245_p13 = scmp.ne.s32.totalorder %s31_s23, %s3244_s13  ;;  %p3250_p1 = scmp.lt.s32.totalorder %s3244_s13, %s3244_s13 }
  0x41   :  { %p3251_p2 = por %p3250_p1, %p3249_p0 }
  0x43   :  { %p3252_p3 = pnand %p3251_p2, %p3245_p13 }
  0x45   :  { %3255 = shalt.err (!%p3252_p3)
}
  0x46   :  { %s3430_s5 = smov 256   ;;  %s3431_s28 = smov 16  }
  0x47   :  { %36 = dma.hbm_to_vmem [thread:$0]  %s4004_s0, 2048, %s31_s23, [#allocation7], %s3430_s5, %s3430_s5, %s3431_s28  }
  0x48   :  { %s3432_s16 = smov [#allocation11]   ;;  %s3433_s18 = smov [#allocation14]  }
  0x49   :  { %s53_s17 = sshll.u32 %s3432_s16, 4  ;;  %s73_s3 = sshll.u32 %s3433_s18, 4  ;;  %s54_s17 = int_to_ptr.vmem [resolvable:$true] %s53_s17  ;;  %s74_s3 = int_to_ptr.vmem [resolvable:$true] %s73_s3 }
  0x4a   :  { %s3256_s20 = scalar_lea.hbm %s4006_s2, 128 }
  0x4b   :  { %p3257_p4 = scmp.ne.s32.totalorder %s4006_s2, %s3256_s20  ;;  %p3260_p5 = scmp.lt.u32.totalorder %s3256_s20, %s4006_s2 }
  0x4d   :  { %p3262_p6 = pnand %p3260_p5, %p3257_p4 }
  0x4f   :  { %3265 = shalt.err (!%p3262_p6)
}
  0x50   :  { %s3266_s0 = scalar_lea.vmem %s54_s17, 128  ;;  %p3271_p8 = scmp.lt.s32.totalorder %s54_s17, %s54_s17 }
  0x51   :  { %p3267_p7 = scmp.ne.s32.totalorder %s54_s17, %s3266_s0  ;;  %p3272_p9 = scmp.lt.s32.totalorder %s3266_s0, %s3266_s0 }
  0x53   :  { %p3273_p10 = por %p3272_p9, %p3271_p8 }
  0x55   :  { %p3274_p11 = pnand %p3273_p10, %p3267_p7 }
  0x57   :  { %3277 = shalt.err (!%p3274_p11)
}
  0x58   :  { %56 = dma.hbm_to_vmem [thread:$0]  %s4006_s2, 128, %s54_s17, [#allocation10]  }
  0x59   :  { %s3278_s30 = scalar_lea.hbm %s4008_s4, 128 }
  0x5a   :  { %p3279_p12 = scmp.ne.s32.totalorder %s4008_s4, %s3278_s30  ;;  %p3282_p13 = scmp.lt.u32.totalorder %s3278_s30, %s4008_s4 }
  0x5c   :  { %p3284_p0 = pnand %p3282_p13, %p3279_p12 }
  0x5e   :  { %3287 = shalt.err (!%p3284_p0)
}
  0x5f   :  { %s3288_s18 = scalar_lea.vmem %s74_s3, 128  ;;  %p3293_p2 = scmp.lt.s32.totalorder %s74_s3, %s74_s3 }
  0x60   :  { %p3289_p1 = scmp.ne.s32.totalorder %s74_s3, %s3288_s18  ;;  %p3294_p3 = scmp.lt.s32.totalorder %s3288_s18, %s3288_s18 }
  0x62   :  { %p3295_p4 = por %p3294_p3, %p3293_p2 }
  0x64   :  { %p3296_p5 = pnand %p3295_p4, %p3289_p1 }
  0x66   :  { %3299 = shalt.err (!%p3296_p5)
}
  0x67   :  { %76 = dma.hbm_to_vmem [thread:$0]  %s4008_s4, 128, %s74_s3, [#allocation13]  }
  0x68   :  { %s3434_s24 = smov [#allocation17]   ;;  %s3300_s25 = scalar_lea.hbm %s4012_s8, 512 }
  0x69   :  { %s98_s19 = sshll.u32 %s3434_s24, 4  ;;  %p3301_p6 = scmp.ne.s32.totalorder %s4012_s8, %s3300_s25  ;;  %s99_s19 = int_to_ptr.vmem [resolvable:$true] %s98_s19 }
  0x6a   :  { %p3304_p7 = scmp.lt.u32.totalorder %s3300_s25, %s4012_s8 }
  0x6c   :  { %p3306_p8 = pnand %p3304_p7, %p3301_p6 }
  0x6e   :  { %3309 = shalt.err (!%p3306_p8)
}
  0x6f   :  { %s3310_s22 = scalar_lea.vmem %s99_s19, 512  ;;  %p3315_p10 = scmp.lt.s32.totalorder %s99_s19, %s99_s19 }
  0x70   :  { %p3311_p9 = scmp.ne.s32.totalorder %s99_s19, %s3310_s22  ;;  %p3316_p11 = scmp.lt.s32.totalorder %s3310_s22, %s3310_s22 }
  0x72   :  { %p3317_p12 = por %p3316_p11, %p3315_p10 }
  0x74   :  { %p3318_p13 = pnand %p3317_p12, %p3311_p9 }
  0x76   :  { %3321 = shalt.err (!%p3318_p13)
}
  0x77   :  { %104 = dma.hbm_to_vmem [thread:$0]  %s4012_s8, 512, %s99_s19, [#allocation16], %s3430_s5, %s3430_s5, %s3431_s28  }
  0x78   :  { %3410 = dma.done.wait [#allocation7], 2048  }
  0x79   :  { %3411 = vsyncadd [#allocation7], 4294965248 }
  0x7a   :  { %3412 = dma.done.wait [#allocation10], 256  }
  0x7b   :  { %3413 = vsyncadd [#allocation10], 4294967040 }
  0x7c   :  { %3414 = dma.done.wait [#allocation13], 256  }
  0x7d   :  { %3415 = vsyncadd [#allocation13], 4294967040 }
  0x7e   :  { %3416 = dma.done.wait [#allocation16], 1536  }
  0x7f   :  { %3417 = vsyncadd [#allocation16], 4294965760  ;;  %v3435_v0 = vmov 0.0|0.0   ;;  %vm3436_vm0 = vmmov 0   ;;  %v3437_v1 = vmov 0.0   ;;  %vm134_vm1 = vcmask 130048  }
  0x80   :  { %2832 = vmatprep.subr.bf16.mxu1 %v3435_v0  ;;  %2628 = vmatprep.mubr.msk.f32.mxu1 %vm3436_vm0, %v3437_v1  ;;  %v148_v2 = vld [vmem:[%s4010_s6] sm:$0xff]  ;;  %v149_v3 = vld [vmem:[%s4010_s6 + $0x8] sm:$0xff]  ;;  %vm131_vm2 = vcmask 523264   ;;  %v142_v10 = vld [vmem:[#allocation15 + $0x10] sm:$0xff]  ;;  %v155_v31 = vlaneseq  ;;  %s3438_s13 = smov 96   ;;  %s3439_s14 = smov 32  }
  0x81   :  { %420 = vmatprep.mubr.f32.mxu0 %v3437_v1  ;;  %v133_v4 = vld [vmem:[#allocation11] sm:$0xff]  ;;  %v3612_v5 = vpack.c.bf16 %v149_v3, %v148_v2  ;;  %v140_v6 = vld [vmem:[#allocation15] sm:$0xff]  ;;  %v143_v11 = vld [vmem:[#allocation15 + $0x18] sm:$0xff]  ;;  %s3440_s15 = smov 80   ;;  %s3441_s16 = smov 64  }
  0x82   :  { %135 = vst.msk [vmem:[#allocation3] sm:$0xff] %vm134_vm1, %v133_v4  ;;  %v141_v7 = vld [vmem:[#allocation15 + $0x8] sm:$0xff]  ;;  %v130_v8 = vld [vmem:[#allocation9] sm:$0xff]  ;;  %v3622_v13 = vpack.c.bf16 %v143_v11, %v142_v10  ;;  %v146_v17 = vld [vmem:[#allocation15 + $0x30] sm:$0xff]  ;;  %v3645_v33 = vand.u32 127, %v155_v31 }
  0x83   :  { %2834 = vmatpush3.bf16.msra.mxu1 %v3612_v5  ;;  %132 = vst.msk [vmem:[#allocation2] sm:$0xff] %vm131_vm2, %v130_v8  ;;  %v3618_v9 = vpack.c.bf16 %v141_v7, %v140_v6  ;;  %v144_v14 = vld [vmem:[#allocation15 + $0x20] sm:$0xff]  ;;  %v145_v15 = vld [vmem:[#allocation15 + $0x28] sm:$0xff]  ;;  %v147_v18 = vld [vmem:[#allocation15 + $0x38] sm:$0xff] }
  0x84   :  { %2835 = vmatprep.subr.bf16.mxu1 %v3435_v0  ;;  %v3628_v16 = vpack.c.bf16 %v145_v15, %v144_v14  ;;  %v3632_v19 = vpack.c.bf16 %v147_v18, %v146_v17  ;;  %v138_v21 = vld [vmem:[#allocation14] sm:$0xff]  ;;  %v3642_v24 = vld [vmem:[%s4011_s7] sm:$0xff]  ;;  %vm157_vm3 = vcmp.ge.s32.totalorder %v3645_v33, 32  ;;  %vm158_vm4 = vcmp.lt.s32.totalorder %v3645_v33, 48  ;;  %v152_v45 = vld [vmem:[#allocation17 + $0x8] sm:$0xff] }
  0x85   :  { %139 = vst.msk [vmem:[#allocation5] sm:$0xff] %vm134_vm1, %v138_v21  ;;  %vm3649_vm5 = vmand %vm157_vm3, %vm158_vm4  ;;  %v154_v46 = vld [vmem:[#allocation17 + $0x18] sm:$0xff]  ;;  %v151_v47 = vld [vmem:[#allocation17] sm:$0xff]  ;;  %v3692_v11 = vadd.s32 128, %v3645_v33 }
  0x86   :  { %v3661_v48 = vpack.c.bf16 %v154_v46, %v152_v45  ;;  %v153_v49 = vld [vmem:[#allocation17 + $0x10] sm:$0xff]  ;;  %v349_v57 = vld [vmem:[#allocation6] sm:$0xff]  ;;  %v350_v58 = vld [vmem:[#allocation6 + $0x8] sm:$0xff] }
  0x87   :  { %v3663_v50 = vpack.c.bf16 %v153_v49, %v151_v47  ;;  %v136_v52 = vld [vmem:[#allocation12] sm:$0xff]  ;;  %vm164_vm6 = vcmp.lt.s32.totalorder %v3692_v11, 192 }
  0x88   :  { %2848 = vmatprep.subr.bf16.mxu0 %v3661_v48  ;;  %137 = vst.msk [vmem:[#allocation4] sm:$0xff] %vm131_vm2, %v136_v52 }
  0x89   :  { %v168_v12 = vld [vmem:[#allocation3] sm:$0xff]  ;;  %2850 = vmatpush1.bf16.msra.mxu0 %v3663_v50 }
  0x8a   :  { %2629 = vmatmul.mubr.msk.f32.vlgmr.msra.gmra.mrb[0].mxu1 %vm134_vm1, %v168_v12  ;;  %v167_v20 = vld [vmem:[#allocation2] sm:$0xff]  ;;  %2851 = vmatprep.subr.bf16.mxu0 %v3435_v0 }
  0x8b   :  { %2837 = vmatpush3.bf16.msra.mxu1 %v3618_v9  ;;  %2647 = vmatprep.mubr.msk.f32.mxu1 %vm3436_vm0, %v3437_v1 }
  0x8c   :  { %2838 = vmatprep.subr.bf16.mxu1 %v3435_v0  ;;  %v170_v38 = vld [vmem:[#allocation5] sm:$0xff] }
  0x8f   :  { %2840 = vmatpush3.bf16.msra.mxu1 %v3622_v13  ;;  %v169_v55 = vld [vmem:[#allocation4] sm:$0xff] }
  0x90   :  { %2841 = vmatprep.subr.bf16.mxu1 %v3435_v0 }
  0x93   :  { %2843 = vmatpush3.bf16.msra.mxu1 %v3628_v16 }
  0x94   :  { %2844 = vmatprep.subr.bf16.mxu1 %v3435_v0 }
  0x97   :  { %2846 = vmatpush3.bf16.msra.mxu1 %v3632_v19 }
  0x98   :  { %2867 = vmatprep.subr.bf16.mxu1 %v3661_v48 }
  0x9a   :  { %2648 = vmatmul.mubr.msk.f32.vlgmr.msra.gmra.mrb[2].mxu1 %vm131_vm2, %v167_v20 }
  0x9b   :  { %701 = vmatprep.mubr.f32.mxu1 %v3437_v1  ;;  %2869 = vmatpush1.bf16.msra.mxu1 %v3663_v50 }
  0x9c   :  { %2870 = vmatprep.subr.bf16.mxu1 %v3435_v0 }
 0x15d   :  { %v241_v22 = vpop.f32.mrb[0].mxu1 }
 0x15e   :  { %v2630_v23 = vpop.f32.mrb[1].mxu1 }
 0x16d   :  { %v315_v25 = vpop.f32.mrb[2].mxu1 }
 0x16e   :  { %v316_v26 = vadd.f32 %v315_v25, %v241_v22  ;;  %v2649_v27 = vpop.f32.mrb[3].mxu1 }
 0x170   :  { %v319_v28 = vadd.f32 %v316_v26, %v3642_v24 }
 0x172   :  { %v2482_v29 = vmul.f32 -1.442695, %v319_v28 }
 0x174   :  { %3007 = vpow2.f32 %v2482_v29 }
 0x175   :  { %3009 = vtanh.f32 %v319_v28 }
 0x17e   :  { %v3008_v30 = vpop.eup %3007 }
 0x17f   :  { %v324_v32 = vadd.f32 1.0, %v3008_v30  ;;  %v3010_v35 = vpop.eup %3009 }
 0x181   :  { %3011 = vrcp.f32 %v324_v32 }
 0x18b   :  { %v3012_v36 = vpop.eup %3011 }
 0x18c   :  { %v327_v37 = vsel %vm3649_vm5, %v3010_v35, %v3012_v36 }
 0x18d   :  { %334 = vrot.lane.b32.xlu0 %v327_v37, %s3438_s13 }
 0x191   :  { %329 = vrot.lane.b32.xlu0 %v170_v38, %s3431_s28 }
 0x1ff   :  { %v335_v39 = vpop.permute.xlu0 %334 }
 0x200   :  { %v337_v40 = vmul.f32 %v335_v39, %v327_v37 }
 0x202   :  { %339 = vrot.lane.b32.xlu1 %v337_v40, %s3431_s28 }
 0x203   :  { %v330_v41 = vpop.permute.xlu0 %329 }
 0x204   :  { %v332_v42 = vmul.f32 %v330_v41, %v327_v37 }
 0x274   :  { %v340_v43 = vpop.permute.xlu1 %339 }
 0x275   :  { %v3658_v44 = vadd.f32 %v340_v43, %v332_v42 }
 0x277   :  { %3013 = vtanh.f32 %v3658_v44 }
 0x281   :  { %v3014_v51 = vpop.eup %3013 }
 0x282   :  { %345 = vrot.lane.b32.xlu1 %v3014_v51, %s3439_s14  ;;  %v631_v51 = vld [vmem:[#allocation6 + $0x18] sm:$0xff] }
 0x286   :  { %446 = vrot.lane.b32.xlu1 %v169_v55, %s3441_s16 }
 0x2f4   :  { %v346_v53 = vpop.permute.xlu1 %345 }
 0x2f5   :  { %v348_v54 = vmul.f32 %v346_v53, %v327_v37 }
 0x2f7   :  { %352 = vrot.lane.b32.xlu0 %v348_v54, %s3440_s15 }
 0x2f8   :  { %v447_v20 = vpop.permute.xlu1 %446 }
 0x369   :  { %v353_v56 = vpop.permute.xlu0 %352 }
 0x36a   :  { %2483 = vmatmul.mubr.msk.f32.vlgmr.msra.gmra.mrb[0].mxu0 %vm134_vm1, %v353_v56 }
 0x36b   :  { %2853 = vmatpush3.bf16.msra.mxu0 %v3612_v5  ;;  %2654 = vmatprep.mubr.msk.f32.mxu0 %vm3436_vm0, %v3437_v1 }
 0x36c   :  { %2854 = vmatprep.subr.bf16.mxu0 %v3435_v0 }
 0x36e   :  { %2655 = vmatmul.mubr.msk.f32.vlgmr.msra.gmra.mrb[2].mxu0 %vm134_vm1, %v353_v56 }
 0x36f   :  { %2856 = vmatpush3.bf16.msra.mxu0 %v3618_v9  ;;  %2673 = vmatprep.mubr.msk.f32.mxu0 %vm3436_vm0, %v3437_v1 }
 0x370   :  { %2857 = vmatprep.subr.bf16.mxu0 %v3435_v0 }
 0x373   :  { %2859 = vmatpush3.bf16.msra.mxu0 %v3622_v13 }
 0x374   :  { %2860 = vmatprep.subr.bf16.mxu0 %v3435_v0 }
 0x377   :  { %2862 = vmatpush3.bf16.msra.mxu0 %v3628_v16 }
 0x378   :  { %2863 = vmatprep.subr.bf16.mxu0 %v3435_v0 }
 0x37b   :  { %2865 = vmatpush3.bf16.msra.mxu0 %v3632_v19 }
 0x37c   :  { %2886 = vmatprep.subr.bf16.mxu0 %v3661_v48 }
 0x43d   :  { %v422_v59 = vpop.f32.mrb[0].mxu0 }
 0x43e   :  { %v427_v60 = vadd.f32 %v422_v59, %v349_v57  ;;  %v424_v61 = vpop.f32.mrb[1].mxu0 }
 0x43f   :  { %v428_v62 = vadd.f32 %v424_v61, %v350_v58 }
 0x440   :  { %v2484_v63 = vmul.f32 -1.442695, %v427_v60 }
 0x441   :  { %v2485_v2 = vmul.f32 -1.442695, %v428_v62  ;;  %v524_v3 = vpop.f32.mrb[2].mxu0 }
 0x442   :  { %3015 = vpow2.f32 %v2484_v63  ;;  %v2656_v4 = vpop.f32.mrb[3].mxu0 }
 0x443   :  { %3017 = vpow2.f32 %v2485_v2 }
 0x444   :  { %3019 = vtanh.f32 %v428_v62 }
 0x44c   :  { %v3016_v6 = vpop.eup %3015 }
 0x44d   :  { %v3018_v7 = vpop.eup %3017  ;;  %v437_v8 = vadd.f32 1.0, %v3016_v6 }
 0x44e   :  { %v438_v10 = vadd.f32 1.0, %v3018_v7  ;;  %v3020_v12 = vpop.eup %3019 }
 0x450   :  { %3021 = vrcp.f32 %v438_v10 }
 0x451   :  { %3023 = vrcp.f32 %v437_v8 }
 0x45a   :  { %v3022_v14 = vpop.eup %3021 }
 0x45b   :  { %v3024_v15 = vpop.eup %3023  ;;  %v444_v17 = vsel %vm164_vm6, %v3020_v12, %v3022_v14 }
 0x45c   :  { %v450_v18 = vmul.f32 %v3024_v15, %v444_v17  ;;  %v449_v21 = vmul.f32 %v3024_v15, %v447_v20 }
 0x45e   :  { %452 = vrot.lane.b32.xlu0 %v450_v18, %s3441_s16 }
 0x4d0   :  { %v453_v22 = vpop.permute.xlu0 %452 }
 0x4d1   :  { %v3698_v23 = vadd.f32 %v453_v22, %v449_v21 }
 0x4d3   :  { %3025 = vtanh.f32 %v3698_v23 }
 0x4dd   :  { %v3026_v25 = vpop.eup %3025 }
 0x4de   :  { %v457_v26 = vmul.f32 %v3026_v25, %v444_v17 }
 0x4e0   :  { %529 = vrot.lane.b32.xlu1 %v457_v26, %s3441_s16 }
 0x552   :  { %v530_v27 = vpop.permute.xlu1 %529 }
 0x553   :  { %2674 = vmatmul.mubr.msk.f32.vlgmr.msra.gmra.mrb[4].mxu0 %vm131_vm2, %v530_v27 }
 0x554   :  { %2888 = vmatpush1.bf16.msra.mxu0 %v3663_v50  ;;  %978 = vmatprep.mubr.f32.mxu0 %v3437_v1 }
 0x555   :  { %2889 = vmatprep.subr.bf16.mxu0 %v3435_v0 }
 0x626   :  { %v599_v28 = vpop.f32.mrb[4].mxu0 }
 0x627   :  { %v600_v29 = vadd.f32 %v599_v28, %v524_v3  ;;  %v2675_v30 = vpop.f32.mrb[5].mxu0 }
 0x629   :  { %v603_v31 = vadd.f32 %v600_v29, %v3642_v24 }
 0x62b   :  { %v2488_v32 = vmul.f32 -1.442695, %v603_v31 }
 0x62d   :  { %3027 = vpow2.f32 %v2488_v32 }
 0x62e   :  { %3029 = vtanh.f32 %v603_v31 }
 0x637   :  { %v3028_v33 = vpop.eup %3027 }
 0x638   :  { %v608_v35 = vadd.f32 1.0, %v3028_v33  ;;  %v3030_v36 = vpop.eup %3029 }
 0x63a   :  { %3031 = vrcp.f32 %v608_v35 }
 0x644   :  { %v3032_v37 = vpop.eup %3031 }
 0x645   :  { %v611_v38 = vsel %vm3649_vm5, %v3030_v36, %v3032_v37 }
 0x646   :  { %614 = vrot.lane.b32.xlu0 %v611_v38, %s3438_s13  ;;  %v612_v41 = vmul.f32 %v611_v38, %v3658_v44  ;;  %v630_v44 = vld [vmem:[#allocation6 + $0x10] sm:$0xff] }
 0x6b8   :  { %v615_v39 = vpop.permute.xlu0 %614 }
 0x6b9   :  { %v617_v40 = vmul.f32 %v615_v39, %v611_v38 }
 0x6bb   :  { %619 = vrot.lane.b32.xlu1 %v617_v40, %s3431_s28  ;;  %v907_v40 = vld [vmem:[#allocation6 + $0x20] sm:$0xff] }
 0x72d   :  { %v620_v42 = vpop.permute.xlu1 %619 }
 0x72e   :  { %v3712_v43 = vadd.f32 %v620_v42, %v612_v41  ;;  %v908_v41 = vld [vmem:[#allocation6 + $0x28] sm:$0xff] }
 0x730   :  { %3033 = vtanh.f32 %v3712_v43 }
 0x73a   :  { %v3034_v45 = vpop.eup %3033 }
 0x73b   :  { %625 = vrot.lane.b32.xlu0 %v3034_v45, %s3439_s14 }
 0x7ad   :  { %v626_v46 = vpop.permute.xlu0 %625 }
 0x7ae   :  { %v628_v47 = vmul.f32 %v626_v46, %v611_v38 }
 0x7b0   :  { %633 = vrot.lane.b32.xlu1 %v628_v47, %s3440_s15 }
 0x822   :  { %v634_v49 = vpop.permute.xlu1 %633 }
 0x823   :  { %2489 = vmatmul.mubr.msk.f32.vlgmr.msra.gmra.mrb[4].mxu1 %vm134_vm1, %v634_v49 }
 0x824   :  { %2872 = vmatpush3.bf16.msra.mxu1 %v3612_v5  ;;  %2680 = vmatprep.mubr.msk.f32.mxu1 %vm3436_vm0, %v3437_v1 }
 0x825   :  { %2873 = vmatprep.subr.bf16.mxu1 %v3435_v0 }
 0x827   :  { %2681 = vmatmul.mubr.msk.f32.vlgmr.msra.gmra.mrb[6].mxu1 %vm134_vm1, %v634_v49 }
 0x828   :  { %2875 = vmatpush3.bf16.msra.mxu1 %v3618_v9  ;;  %2699 = vmatprep.mubr.msk.f32.mxu1 %vm3436_vm0, %v3437_v1 }
 0x829   :  { %2876 = vmatprep.subr.bf16.mxu1 %v3435_v0 }
 0x82c   :  { %2878 = vmatpush3.bf16.msra.mxu1 %v3622_v13 }
 0x82d   :  { %2879 = vmatprep.subr.bf16.mxu1 %v3435_v0 }
 0x830   :  { %2881 = vmatpush3.bf16.msra.mxu1 %v3628_v16 }
 0x831   :  { %2882 = vmatprep.subr.bf16.mxu1 %v3435_v0 }
 0x834   :  { %2884 = vmatpush3.bf16.msra.mxu1 %v3632_v19 }
 0x835   :  { %2905 = vmatprep.subr.bf16.mxu1 %v3661_v48 }
 0x8f6   :  { %v703_v52 = vpop.f32.mrb[4].mxu1 }
 0x8f7   :  { %v708_v53 = vadd.f32 %v703_v52, %v630_v44  ;;  %v705_v54 = vpop.f32.mrb[5].mxu1 }
 0x8f8   :  { %v709_v55 = vadd.f32 %v705_v54, %v631_v51 }
 0x8f9   :  { %v2490_v56 = vmul.f32 -1.442695, %v708_v53 }
 0x8fa   :  { %v2491_v57 = vmul.f32 -1.442695, %v709_v55  ;;  %v801_v58 = vpop.f32.mrb[6].mxu1 }
 0x8fb   :  { %3035 = vpow2.f32 %v2490_v56  ;;  %v2682_v59 = vpop.f32.mrb[7].mxu1 }
 0x8fc   :  { %3037 = vpow2.f32 %v2491_v57 }
 0x8fd   :  { %3039 = vtanh.f32 %v709_v55 }
 0x905   :  { %v3036_v60 = vpop.eup %3035 }
 0x906   :  { %v3038_v61 = vpop.eup %3037  ;;  %v718_v62 = vadd.f32 1.0, %v3036_v60 }
 0x907   :  { %v719_v63 = vadd.f32 1.0, %v3038_v61  ;;  %v3040_v2 = vpop.eup %3039 }
 0x909   :  { %3041 = vrcp.f32 %v719_v63 }
 0x90a   :  { %3043 = vrcp.f32 %v718_v62 }
 0x913   :  { %v3042_v3 = vpop.eup %3041 }
 0x914   :  { %v3044_v4 = vpop.eup %3043  ;;  %v725_v6 = vsel %vm164_vm6, %v3040_v2, %v3042_v3 }
 0x915   :  { %v727_v7 = vmul.f32 %v3044_v4, %v725_v6  ;;  %v726_v8 = vmul.f32 %v3044_v4, %v3698_v23 }
 0x917   :  { %729 = vrot.lane.b32.xlu0 %v727_v7, %s3441_s16 }
 0x989   :  { %v730_v10 = vpop.permute.xlu0 %729 }
 0x98a   :  { %v3737_v12 = vadd.f32 %v730_v10, %v726_v8 }
 0x98c   :  { %3045 = vtanh.f32 %v3737_v12 }
 0x996   :  { %v3046_v14 = vpop.eup %3045 }
 0x997   :  { %v734_v15 = vmul.f32 %v3046_v14, %v725_v6 }
 0x999   :  { %806 = vrot.lane.b32.xlu1 %v734_v15, %s3441_s16 }
 0xa0b   :  { %v807_v17 = vpop.permute.xlu1 %806 }
 0xa0c   :  { %2700 = vmatmul.mubr.msk.f32.vlgmr.msra.gmra.mrb[8].mxu1 %vm131_vm2, %v807_v17 }
 0xa0d   :  { %2907 = vmatpush1.bf16.msra.mxu1 %v3663_v50  ;;  %1255 = vmatprep.mubr.f32.mxu1 %v3437_v1 }
 0xa0e   :  { %2908 = vmatprep.subr.bf16.mxu1 %v3435_v0 }
 0xadf   :  { %v876_v18 = vpop.f32.mrb[8].mxu1 }
 0xae0   :  { %v877_v20 = vadd.f32 %v876_v18, %v801_v58  ;;  %v2701_v21 = vpop.f32.mrb[9].mxu1 }
 0xae2   :  { %v880_v22 = vadd.f32 %v877_v20, %v3642_v24 }
 0xae4   :  { %v2494_v23 = vmul.f32 -1.442695, %v880_v22 }
 0xae6   :  { %3047 = vpow2.f32 %v2494_v23 }
 0xae7   :  { %3049 = vtanh.f32 %v880_v22 }
 0xaf0   :  { %v3048_v25 = vpop.eup %3047 }
 0xaf1   :  { %v885_v26 = vadd.f32 1.0, %v3048_v25  ;;  %v3050_v27 = vpop.eup %3049 }
 0xaf3   :  { %3051 = vrcp.f32 %v885_v26 }
 0xafd   :  { %v3052_v28 = vpop.eup %3051 }
 0xafe   :  { %v888_v29 = vsel %vm3649_vm5, %v3050_v27, %v3052_v28 }
 0xaff   :  { %891 = vrot.lane.b32.xlu0 %v888_v29, %s3438_s13  ;;  %v889_v32 = vmul.f32 %v888_v29, %v3712_v43 }
 0xb71   :  { %v892_v30 = vpop.permute.xlu0 %891 }
 0xb72   :  { %v894_v31 = vmul.f32 %v892_v30, %v888_v29 }
 0xb74   :  { %896 = vrot.lane.b32.xlu1 %v894_v31, %s3431_s28  ;;  %v1184_v31 = vld [vmem:[#allocation6 + $0x30] sm:$0xff] }
 0xbe6   :  { %v897_v33 = vpop.permute.xlu1 %896 }
 0xbe7   :  { %v3751_v35 = vadd.f32 %v897_v33, %v889_v32  ;;  %v1185_v32 = vld [vmem:[#allocation6 + $0x38] sm:$0xff] }
 0xbe9   :  { %3053 = vtanh.f32 %v3751_v35 }
 0xbf3   :  { %v3054_v36 = vpop.eup %3053 }
 0xbf4   :  { %902 = vrot.lane.b32.xlu0 %v3054_v36, %s3439_s14 }
 0xc66   :  { %v903_v37 = vpop.permute.xlu0 %902 }
 0xc67   :  { %v905_v38 = vmul.f32 %v903_v37, %v888_v29 }
 0xc69   :  { %910 = vrot.lane.b32.xlu1 %v905_v38, %s3440_s15 }
 0xcdb   :  { %v911_v39 = vpop.permute.xlu1 %910 }
 0xcdc   :  { %2495 = vmatmul.mubr.msk.f32.vlgmr.msra.gmra.mrb[6].mxu0 %vm134_vm1, %v911_v39 }
 0xcdd   :  { %2891 = vmatpush3.bf16.msra.mxu0 %v3612_v5  ;;  %2706 = vmatprep.mubr.msk.f32.mxu0 %vm3436_vm0, %v3437_v1 }
 0xcde   :  { %2892 = vmatprep.subr.bf16.mxu0 %v3435_v0 }
 0xce0   :  { %2707 = vmatmul.mubr.msk.f32.vlgmr.msra.gmra.mrb[8].mxu0 %vm134_vm1, %v911_v39 }
 0xce1   :  { %2894 = vmatpush3.bf16.msra.mxu0 %v3618_v9  ;;  %2725 = vmatprep.mubr.msk.f32.mxu0 %vm3436_vm0, %v3437_v1 }
 0xce2   :  { %2895 = vmatprep.subr.bf16.mxu0 %v3435_v0 }
 0xce5   :  { %2897 = vmatpush3.bf16.msra.mxu0 %v3622_v13 }
 0xce6   :  { %2898 = vmatprep.subr.bf16.mxu0 %v3435_v0 }
 0xce9   :  { %2900 = vmatpush3.bf16.msra.mxu0 %v3628_v16 }
 0xcea   :  { %2901 = vmatprep.subr.bf16.mxu0 %v3435_v0 }
 0xced   :  { %2903 = vmatpush3.bf16.msra.mxu0 %v3632_v19 }
 0xcee   :  { %2924 = vmatprep.subr.bf16.mxu0 %v3661_v48 }
 0xdaf   :  { %v980_v42 = vpop.f32.mrb[6].mxu0 }
 0xdb0   :  { %v985_v43 = vadd.f32 %v980_v42, %v907_v40  ;;  %v982_v45 = vpop.f32.mrb[7].mxu0 }
 0xdb1   :  { %v986_v46 = vadd.f32 %v982_v45, %v908_v41 }
 0xdb2   :  { %v2496_v47 = vmul.f32 -1.442695, %v985_v43 }
 0xdb3   :  { %v2497_v49 = vmul.f32 -1.442695, %v986_v46  ;;  %v1078_v44 = vpop.f32.mrb[8].mxu0 }
 0xdb4   :  { %3055 = vpow2.f32 %v2496_v47  ;;  %v2708_v51 = vpop.f32.mrb[9].mxu0 }
 0xdb5   :  { %3057 = vpow2.f32 %v2497_v49 }
 0xdb6   :  { %3059 = vtanh.f32 %v986_v46 }
 0xdbe   :  { %v3056_v52 = vpop.eup %3055 }
 0xdbf   :  { %v3058_v53 = vpop.eup %3057  ;;  %v995_v54 = vadd.f32 1.0, %v3056_v52 }
 0xdc0   :  { %v996_v55 = vadd.f32 1.0, %v3058_v53  ;;  %v3060_v56 = vpop.eup %3059 }
 0xdc2   :  { %3061 = vrcp.f32 %v996_v55 }
 0xdc3   :  { %3063 = vrcp.f32 %v995_v54 }
 0xdcc   :  { %v3062_v57 = vpop.eup %3061 }
 0xdcd   :  { %v3064_v58 = vpop.eup %3063  ;;  %v1002_v59 = vsel %vm164_vm6, %v3060_v56, %v3062_v57 }
 0xdce   :  { %v1004_v60 = vmul.f32 %v3064_v58, %v1002_v59  ;;  %v1003_v61 = vmul.f32 %v3064_v58, %v3737_v12 }
 0xdd0   :  { %1006 = vrot.lane.b32.xlu0 %v1004_v60, %s3441_s16 }
 0xe42   :  { %v1007_v62 = vpop.permute.xlu0 %1006 }
 0xe43   :  { %v3776_v63 = vadd.f32 %v1007_v62, %v1003_v61 }
 0xe45   :  { %3065 = vtanh.f32 %v3776_v63 }
 0xe4f   :  { %v3066_v2 = vpop.eup %3065 }
 0xe50   :  { %v1011_v3 = vmul.f32 %v3066_v2, %v1002_v59 }
 0xe52   :  { %1083 = vrot.lane.b32.xlu1 %v1011_v3, %s3441_s16 }
 0xec4   :  { %v1084_v4 = vpop.permute.xlu1 %1083 }
 0xec5   :  { %2726 = vmatmul.mubr.msk.f32.vlgmr.msra.gmra.mrb[10].mxu0 %vm131_vm2, %v1084_v4 }
 0xec6   :  { %2926 = vmatpush1.bf16.msra.mxu0 %v3663_v50  ;;  %1532 = vmatprep.mubr.f32.mxu0 %v3437_v1 }
 0xec7   :  { %2927 = vmatprep.subr.bf16.mxu0 %v3435_v0 }
 0xf98   :  { %v1153_v6 = vpop.f32.mrb[10].mxu0 }
 0xf99   :  { %v1154_v7 = vadd.f32 %v1153_v6, %v1078_v44  ;;  %v2727_v8 = vpop.f32.mrb[11].mxu0 }
 0xf9b   :  { %v1157_v10 = vadd.f32 %v1154_v7, %v3642_v24 }
 0xf9d   :  { %v2500_v12 = vmul.f32 -1.442695, %v1157_v10 }
 0xf9f   :  { %3067 = vpow2.f32 %v2500_v12 }
 0xfa0   :  { %3069 = vtanh.f32 %v1157_v10 }
 0xfa9   :  { %v3068_v14 = vpop.eup %3067 }
 0xfaa   :  { %v1162_v15 = vadd.f32 1.0, %v3068_v14  ;;  %v3070_v17 = vpop.eup %3069 }
 0xfac   :  { %3071 = vrcp.f32 %v1162_v15 }
 0xfb6   :  { %v3072_v18 = vpop.eup %3071 }
 0xfb7   :  { %v1165_v20 = vsel %vm3649_vm5, %v3070_v17, %v3072_v18 }
 0xfb8   :  { %1168 = vrot.lane.b32.xlu0 %v1165_v20, %s3438_s13  ;;  %v1166_v23 = vmul.f32 %v1165_v20, %v3751_v35 }
0x102a   :  { %v1169_v21 = vpop.permute.xlu0 %1168 }
0x102b   :  { %v1171_v22 = vmul.f32 %v1169_v21, %v1165_v20 }
0x102d   :  { %1173 = vrot.lane.b32.xlu1 %v1171_v22, %s3431_s28  ;;  %v1461_v22 = vld [vmem:[#allocation6 + $0x40] sm:$0xff] }
0x109f   :  { %v1174_v25 = vpop.permute.xlu1 %1173 }
0x10a0   :  { %v3790_v26 = vadd.f32 %v1174_v25, %v1166_v23  ;;  %v1462_v23 = vld [vmem:[#allocation6 + $0x48] sm:$0xff] }
0x10a2   :  { %3073 = vtanh.f32 %v3790_v26 }
0x10ac   :  { %v3074_v27 = vpop.eup %3073 }
0x10ad   :  { %1179 = vrot.lane.b32.xlu0 %v3074_v27, %s3439_s14 }
0x111f   :  { %v1180_v28 = vpop.permute.xlu0 %1179 }
0x1120   :  { %v1182_v29 = vmul.f32 %v1180_v28, %v1165_v20 }
0x1122   :  { %1187 = vrot.lane.b32.xlu1 %v1182_v29, %s3440_s15 }
0x1194   :  { %v1188_v30 = vpop.permute.xlu1 %1187 }
0x1195   :  { %2501 = vmatmul.mubr.msk.f32.vlgmr.msra.gmra.mrb[10].mxu1 %vm134_vm1, %v1188_v30 }
0x1196   :  { %2910 = vmatpush3.bf16.msra.mxu1 %v3612_v5  ;;  %2732 = vmatprep.mubr.msk.f32.mxu1 %vm3436_vm0, %v3437_v1 }
0x1197   :  { %2911 = vmatprep.subr.bf16.mxu1 %v3435_v0 }
0x1199   :  { %2733 = vmatmul.mubr.msk.f32.vlgmr.msra.gmra.mrb[12].mxu1 %vm134_vm1, %v1188_v30 }
0x119a   :  { %2913 = vmatpush3.bf16.msra.mxu1 %v3618_v9  ;;  %2751 = vmatprep.mubr.msk.f32.mxu1 %vm3436_vm0, %v3437_v1 }
0x119b   :  { %2914 = vmatprep.subr.bf16.mxu1 %v3435_v0 }
0x119e   :  { %2916 = vmatpush3.bf16.msra.mxu1 %v3622_v13 }
0x119f   :  { %2917 = vmatprep.subr.bf16.mxu1 %v3435_v0 }
0x11a2   :  { %2919 = vmatpush3.bf16.msra.mxu1 %v3628_v16 }
0x11a3   :  { %2920 = vmatprep.subr.bf16.mxu1 %v3435_v0 }
0x11a6   :  { %2922 = vmatpush3.bf16.msra.mxu1 %v3632_v19 }
0x11a7   :  { %2943 = vmatprep.subr.bf16.mxu1 %v3661_v48 }
0x1268   :  { %v1257_v33 = vpop.f32.mrb[10].mxu1 }
0x1269   :  { %v1262_v35 = vadd.f32 %v1257_v33, %v1184_v31  ;;  %v1259_v36 = vpop.f32.mrb[11].mxu1 }
0x126a   :  { %v1263_v37 = vadd.f32 %v1259_v36, %v1185_v32 }
0x126b   :  { %v2502_v38 = vmul.f32 -1.442695, %v1262_v35 }
0x126c   :  { %v2503_v39 = vmul.f32 -1.442695, %v1263_v37  ;;  %v1355_v40 = vpop.f32.mrb[12].mxu1 }
0x126d   :  { %3075 = vpow2.f32 %v2502_v38  ;;  %v2734_v41 = vpop.f32.mrb[13].mxu1 }
0x126e   :  { %3077 = vpow2.f32 %v2503_v39 }
0x126f   :  { %3079 = vtanh.f32 %v1263_v37 }
0x1277   :  { %v3076_v42 = vpop.eup %3075 }
0x1278   :  { %v3078_v43 = vpop.eup %3077  ;;  %v1272_v45 = vadd.f32 1.0, %v3076_v42 }
0x1279   :  { %v1273_v46 = vadd.f32 1.0, %v3078_v43  ;;  %v3080_v47 = vpop.eup %3079 }
0x127b   :  { %3081 = vrcp.f32 %v1273_v46 }
0x127c   :  { %3083 = vrcp.f32 %v1272_v45 }
0x1285   :  { %v3082_v49 = vpop.eup %3081 }
0x1286   :  { %v3084_v44 = vpop.eup %3083  ;;  %v1279_v51 = vsel %vm164_vm6, %v3080_v47, %v3082_v49 }
0x1287   :  { %v1281_v52 = vmul.f32 %v3084_v44, %v1279_v51  ;;  %v1280_v53 = vmul.f32 %v3084_v44, %v3776_v63 }
0x1289   :  { %1283 = vrot.lane.b32.xlu0 %v1281_v52, %s3441_s16 }
0x12fb   :  { %v1284_v54 = vpop.permute.xlu0 %1283 }
0x12fc   :  { %v3815_v55 = vadd.f32 %v1284_v54, %v1280_v53 }
0x12fe   :  { %3085 = vtanh.f32 %v3815_v55 }
0x1308   :  { %v3086_v56 = vpop.eup %3085 }
0x1309   :  { %v1288_v57 = vmul.f32 %v3086_v56, %v1279_v51 }
0x130b   :  { %1360 = vrot.lane.b32.xlu1 %v1288_v57, %s3441_s16 }
0x137d   :  { %v1361_v58 = vpop.permute.xlu1 %1360 }
0x137e   :  { %2752 = vmatmul.mubr.msk.f32.vlgmr.msra.gmra.mrb[14].mxu1 %vm131_vm2, %v1361_v58 }
0x137f   :  { %2945 = vmatpush1.bf16.msra.mxu1 %v3663_v50  ;;  %1809 = vmatprep.mubr.f32.mxu1 %v3437_v1 }
0x1380   :  { %2946 = vmatprep.subr.bf16.mxu1 %v3435_v0 }
0x1451   :  { %v1430_v59 = vpop.f32.mrb[14].mxu1 }
0x1452   :  { %v1431_v60 = vadd.f32 %v1430_v59, %v1355_v40  ;;  %v2753_v61 = vpop.f32.mrb[15].mxu1 }
0x1454   :  { %v1434_v62 = vadd.f32 %v1431_v60, %v3642_v24 }
0x1456   :  { %v2506_v63 = vmul.f32 -1.442695, %v1434_v62 }
0x1458   :  { %3087 = vpow2.f32 %v2506_v63 }
0x1459   :  { %3089 = vtanh.f32 %v1434_v62 }
0x1462   :  { %v3088_v2 = vpop.eup %3087 }
0x1463   :  { %v1439_v3 = vadd.f32 1.0, %v3088_v2  ;;  %v3090_v4 = vpop.eup %3089 }
0x1465   :  { %3091 = vrcp.f32 %v1439_v3 }
0x146f   :  { %v3092_v6 = vpop.eup %3091 }
0x1470   :  { %v1442_v7 = vsel %vm3649_vm5, %v3090_v4, %v3092_v6 }
0x1471   :  { %1445 = vrot.lane.b32.xlu0 %v1442_v7, %s3438_s13  ;;  %v1443_v12 = vmul.f32 %v1442_v7, %v3790_v26 }
0x14e3   :  { %v1446_v8 = vpop.permute.xlu0 %1445 }
0x14e4   :  { %v1448_v10 = vmul.f32 %v1446_v8, %v1442_v7 }
0x14e6   :  { %1450 = vrot.lane.b32.xlu1 %v1448_v10, %s3431_s28  ;;  %v1738_v10 = vld [vmem:[#allocation6 + $0x50] sm:$0xff] }
0x1558   :  { %v1451_v14 = vpop.permute.xlu1 %1450 }
0x1559   :  { %v3829_v15 = vadd.f32 %v1451_v14, %v1443_v12  ;;  %v1739_v12 = vld [vmem:[#allocation6 + $0x58] sm:$0xff] }
0x155b   :  { %3093 = vtanh.f32 %v3829_v15 }
0x1565   :  { %v3094_v17 = vpop.eup %3093 }
0x1566   :  { %1456 = vrot.lane.b32.xlu0 %v3094_v17, %s3439_s14 }
0x15d8   :  { %v1457_v18 = vpop.permute.xlu0 %1456 }
0x15d9   :  { %v1459_v20 = vmul.f32 %v1457_v18, %v1442_v7 }
0x15db   :  { %1464 = vrot.lane.b32.xlu1 %v1459_v20, %s3440_s15 }
0x164d   :  { %v1465_v21 = vpop.permute.xlu1 %1464 }
0x164e   :  { %2507 = vmatmul.mubr.msk.f32.vlgmr.msra.gmra.mrb[12].mxu0 %vm134_vm1, %v1465_v21 }
0x164f   :  { %2929 = vmatpush3.bf16.msra.mxu0 %v3612_v5  ;;  %2758 = vmatprep.mubr.msk.f32.mxu0 %vm3436_vm0, %v3437_v1 }
0x1650   :  { %2930 = vmatprep.subr.bf16.mxu0 %v3435_v0 }
0x1652   :  { %2759 = vmatmul.mubr.msk.f32.vlgmr.msra.gmra.mrb[14].mxu0 %vm134_vm1, %v1465_v21 }
0x1653   :  { %2932 = vmatpush3.bf16.msra.mxu0 %v3618_v9  ;;  %2777 = vmatprep.mubr.msk.f32.mxu0 %vm3436_vm0, %v3437_v1 }
0x1654   :  { %2933 = vmatprep.subr.bf16.mxu0 %v3435_v0 }
0x1657   :  { %2935 = vmatpush3.bf16.msra.mxu0 %v3622_v13 }
0x1658   :  { %2936 = vmatprep.subr.bf16.mxu0 %v3435_v0 }
0x165b   :  { %2938 = vmatpush3.bf16.msra.mxu0 %v3628_v16 }
0x165c   :  { %2939 = vmatprep.subr.bf16.mxu0 %v3435_v0 }
0x165f   :  { %2941 = vmatpush3.bf16.msra.mxu0 %v3632_v19 }
0x1660   :  { %2962 = vmatprep.subr.bf16.mxu0 %v3661_v48 }
0x1721   :  { %v1534_v25 = vpop.f32.mrb[12].mxu0 }
0x1722   :  { %v1539_v26 = vadd.f32 %v1534_v25, %v1461_v22  ;;  %v1536_v27 = vpop.f32.mrb[13].mxu0 }
0x1723   :  { %v1540_v28 = vadd.f32 %v1536_v27, %v1462_v23 }
0x1724   :  { %v2508_v29 = vmul.f32 -1.442695, %v1539_v26 }
0x1725   :  { %v2509_v30 = vmul.f32 -1.442695, %v1540_v28  ;;  %v1632_v31 = vpop.f32.mrb[14].mxu0 }
0x1726   :  { %3095 = vpow2.f32 %v2508_v29  ;;  %v2760_v32 = vpop.f32.mrb[15].mxu0 }
0x1727   :  { %3097 = vpow2.f32 %v2509_v30 }
0x1728   :  { %3099 = vtanh.f32 %v1540_v28 }
0x1730   :  { %v3096_v33 = vpop.eup %3095 }
0x1731   :  { %v3098_v35 = vpop.eup %3097  ;;  %v1549_v36 = vadd.f32 1.0, %v3096_v33 }
0x1732   :  { %v1550_v37 = vadd.f32 1.0, %v3098_v35  ;;  %v3100_v38 = vpop.eup %3099 }
0x1734   :  { %3101 = vrcp.f32 %v1550_v37 }
0x1735   :  { %3103 = vrcp.f32 %v1549_v36 }
0x173e   :  { %v3102_v39 = vpop.eup %3101 }
0x173f   :  { %v3104_v40 = vpop.eup %3103  ;;  %v1556_v41 = vsel %vm164_vm6, %v3100_v38, %v3102_v39 }
0x1740   :  { %v1558_v42 = vmul.f32 %v3104_v40, %v1556_v41  ;;  %v1557_v43 = vmul.f32 %v3104_v40, %v3815_v55 }
0x1742   :  { %1560 = vrot.lane.b32.xlu0 %v1558_v42, %s3441_s16 }
0x17b4   :  { %v1561_v45 = vpop.permute.xlu0 %1560 }
0x17b5   :  { %v3854_v46 = vadd.f32 %v1561_v45, %v1557_v43 }
0x17b7   :  { %3105 = vtanh.f32 %v3854_v46 }
0x17c1   :  { %v3106_v47 = vpop.eup %3105 }
0x17c2   :  { %v1565_v49 = vmul.f32 %v3106_v47, %v1556_v41 }
0x17c4   :  { %1637 = vrot.lane.b32.xlu1 %v1565_v49, %s3441_s16 }
0x1836   :  { %v1638_v44 = vpop.permute.xlu1 %1637 }
0x1837   :  { %2778 = vmatmul.mubr.msk.f32.vlgmr.msra.gmra.mrb[16].mxu0 %vm131_vm2, %v1638_v44 }
0x1838   :  { %2964 = vmatpush1.bf16.msra.mxu0 %v3663_v50  ;;  %2086 = vmatprep.mubr.f32.mxu0 %v3437_v1 }
0x1839   :  { %2965 = vmatprep.subr.bf16.mxu0 %v3435_v0 }
0x190a   :  { %v1707_v51 = vpop.f32.mrb[16].mxu0 }
0x190b   :  { %v1708_v52 = vadd.f32 %v1707_v51, %v1632_v31  ;;  %v2779_v53 = vpop.f32.mrb[17].mxu0 }
0x190d   :  { %v1711_v54 = vadd.f32 %v1708_v52, %v3642_v24 }
0x190f   :  { %v2512_v55 = vmul.f32 -1.442695, %v1711_v54 }
0x1911   :  { %3107 = vpow2.f32 %v2512_v55 }
0x1912   :  { %3109 = vtanh.f32 %v1711_v54 }
0x191b   :  { %v3108_v56 = vpop.eup %3107 }
0x191c   :  { %v1716_v57 = vadd.f32 1.0, %v3108_v56  ;;  %v3110_v58 = vpop.eup %3109 }
0x191e   :  { %3111 = vrcp.f32 %v1716_v57 }
0x1928   :  { %v3112_v59 = vpop.eup %3111 }
0x1929   :  { %v1719_v60 = vsel %vm3649_vm5, %v3110_v58, %v3112_v59  ;;  %v2016_v59 = vld [vmem:[#allocation6 + $0x68] sm:$0xff] }
0x192a   :  { %1722 = vrot.lane.b32.xlu0 %v1719_v60, %s3438_s13  ;;  %v1720_v63 = vmul.f32 %v1719_v60, %v3829_v15 }
0x199c   :  { %v1723_v61 = vpop.permute.xlu0 %1722 }
0x199d   :  { %v1725_v62 = vmul.f32 %v1723_v61, %v1719_v60 }
0x199f   :  { %1727 = vrot.lane.b32.xlu1 %v1725_v62, %s3431_s28 }
0x1a11   :  { %v1728_v2 = vpop.permute.xlu1 %1727 }
0x1a12   :  { %v3868_v3 = vadd.f32 %v1728_v2, %v1720_v63 }
0x1a14   :  { %3113 = vtanh.f32 %v3868_v3 }
0x1a1e   :  { %v3114_v4 = vpop.eup %3113 }
0x1a1f   :  { %1733 = vrot.lane.b32.xlu0 %v3114_v4, %s3439_s14 }
0x1a91   :  { %v1734_v6 = vpop.permute.xlu0 %1733 }
0x1a92   :  { %v1736_v7 = vmul.f32 %v1734_v6, %v1719_v60 }
0x1a94   :  { %1741 = vrot.lane.b32.xlu1 %v1736_v7, %s3440_s15 }
0x1b06   :  { %v1742_v8 = vpop.permute.xlu1 %1741 }
0x1b07   :  { %2513 = vmatmul.mubr.msk.f32.vlgmr.msra.gmra.mrb[16].mxu1 %vm134_vm1, %v1742_v8 }
0x1b08   :  { %2948 = vmatpush3.bf16.msra.mxu1 %v3612_v5  ;;  %2784 = vmatprep.mubr.msk.f32.mxu1 %vm3436_vm0, %v3437_v1 }
0x1b09   :  { %2949 = vmatprep.subr.bf16.mxu1 %v3435_v0 }
0x1b0b   :  { %2785 = vmatmul.mubr.msk.f32.vlgmr.msra.gmra.mrb[18].mxu1 %vm134_vm1, %v1742_v8 }
0x1b0c   :  { %2951 = vmatpush3.bf16.msra.mxu1 %v3618_v9  ;;  %2803 = vmatprep.mubr.msk.f32.mxu1 %vm3436_vm0, %v3437_v1 }
0x1b0d   :  { %2952 = vmatprep.subr.bf16.mxu1 %v3435_v0 }
0x1b10   :  { %2954 = vmatpush3.bf16.msra.mxu1 %v3622_v13 }
0x1b11   :  { %2955 = vmatprep.subr.bf16.mxu1 %v3435_v0 }
0x1b14   :  { %2957 = vmatpush3.bf16.msra.mxu1 %v3628_v16 }
0x1b15   :  { %2958 = vmatprep.subr.bf16.mxu1 %v3435_v0 }
0x1b18   :  { %2960 = vmatpush3.bf16.msra.mxu1 %v3632_v19 }
0x1b19   :  { %2981 = vmatprep.subr.bf16.mxu1 %v3661_v48 }
0x1bda   :  { %v1811_v14 = vpop.f32.mrb[16].mxu1 }
0x1bdb   :  { %v1816_v15 = vadd.f32 %v1811_v14, %v1738_v10  ;;  %v1813_v17 = vpop.f32.mrb[17].mxu1 }
0x1bdc   :  { %v1817_v18 = vadd.f32 %v1813_v17, %v1739_v12 }
0x1bdd   :  { %v2514_v20 = vmul.f32 -1.442695, %v1816_v15 }
0x1bde   :  { %v2515_v21 = vmul.f32 -1.442695, %v1817_v18  ;;  %v1909_v22 = vpop.f32.mrb[18].mxu1 }
0x1bdf   :  { %3115 = vpow2.f32 %v2514_v20  ;;  %v2786_v23 = vpop.f32.mrb[19].mxu1 }
0x1be0   :  { %3117 = vpow2.f32 %v2515_v21 }
0x1be1   :  { %3119 = vtanh.f32 %v1817_v18 }
0x1be9   :  { %v3116_v25 = vpop.eup %3115 }
0x1bea   :  { %v3118_v26 = vpop.eup %3117  ;;  %v1826_v27 = vadd.f32 1.0, %v3116_v25  ;;  %v3167_v25 = vld [vmem:[%s4011_s7] sm:$0xff]  ;;  %s3442_s7 = smov [#allocation19]  }
0x1beb   :  { %v1827_v28 = vadd.f32 1.0, %v3118_v26  ;;  %v3120_v48 = vpop.eup %3119 }
0x1bed   :  { %3121 = vrcp.f32 %v1827_v28 }
0x1bee   :  { %3123 = vrcp.f32 %v1826_v27 }
0x1bf7   :  { %v3122_v29 = vpop.eup %3121 }
0x1bf8   :  { %v3124_v30 = vpop.eup %3123  ;;  %v1833_v31 = vsel %vm164_vm6, %v3120_v48, %v3122_v29 }
0x1bf9   :  { %v1835_v32 = vmul.f32 %v3124_v30, %v1833_v31  ;;  %v1834_v33 = vmul.f32 %v3124_v30, %v3854_v46 }
0x1bfb   :  { %1837 = vrot.lane.b32.xlu0 %v1835_v32, %s3441_s16 }
0x1c6d   :  { %v1838_v35 = vpop.permute.xlu0 %1837 }
0x1c6e   :  { %v3893_v36 = vadd.f32 %v1838_v35, %v1834_v33 }
0x1c70   :  { %3125 = vtanh.f32 %v3893_v36 }
0x1c7a   :  { %v3126_v37 = vpop.eup %3125 }
0x1c7b   :  { %v1842_v38 = vmul.f32 %v3126_v37, %v1833_v31 }
0x1c7d   :  { %1914 = vrot.lane.b32.xlu1 %v1842_v38, %s3441_s16 }
0x1cef   :  { %v1915_v39 = vpop.permute.xlu1 %1914 }
0x1cf0   :  { %2804 = vmatmul.mubr.msk.f32.vlgmr.msra.gmra.mrb[20].mxu1 %vm131_vm2, %v1915_v39 }
0x1cf1   :  { %2983 = vmatpush1.bf16.msra.mxu1 %v3663_v50  ;;  %2363 = vmatprep.mubr.f32.mxu1 %v3437_v1 }
0x1dc3   :  { %v1984_v40 = vpop.f32.mrb[20].mxu1 }
0x1dc4   :  { %v1985_v41 = vadd.f32 %v1984_v40, %v1909_v22  ;;  %v2805_v42 = vpop.f32.mrb[21].mxu1 }
0x1dc5   :  { %v2293_v42 = vld [vmem:[#allocation6 + $0x78] sm:$0xff] }
0x1dc6   :  { %v1988_v43 = vadd.f32 %v1985_v41, %v3642_v24  ;;  %v2292_v41 = vld [vmem:[#allocation6 + $0x70] sm:$0xff] }
0x1dc8   :  { %v2518_v45 = vmul.f32 -1.442695, %v1988_v43 }
0x1dca   :  { %3127 = vpow2.f32 %v2518_v45 }
0x1dcb   :  { %3129 = vtanh.f32 %v1988_v43 }
0x1dd4   :  { %v3128_v46 = vpop.eup %3127 }
0x1dd5   :  { %v1993_v47 = vadd.f32 1.0, %v3128_v46  ;;  %v3130_v49 = vpop.eup %3129 }
0x1dd7   :  { %3131 = vrcp.f32 %v1993_v47 }
0x1de1   :  { %v3132_v44 = vpop.eup %3131 }
0x1de2   :  { %v1996_v51 = vsel %vm3649_vm5, %v3130_v49, %v3132_v44 }
0x1de3   :  { %1999 = vrot.lane.b32.xlu0 %v1996_v51, %s3438_s13  ;;  %v1997_v53 = vmul.f32 %v1996_v51, %v3868_v3 }
0x1e55   :  { %v2000_v50 = vpop.permute.xlu0 %1999 }
0x1e56   :  { %v2002_v52 = vmul.f32 %v2000_v50, %v1996_v51 }
0x1e58   :  { %2004 = vrot.lane.b32.xlu1 %v2002_v52, %s3431_s28 }
0x1eca   :  { %v2005_v24 = vpop.permute.xlu1 %2004 }
0x1ecb   :  { %v3906_v54 = vadd.f32 %v2005_v24, %v1997_v53 }
0x1ecd   :  { %3133 = vtanh.f32 %v3906_v54 }
0x1ed7   :  { %v3134_v55 = vpop.eup %3133 }
0x1ed8   :  { %2010 = vrot.lane.b32.xlu0 %v3134_v55, %s3439_s14 }
0x1f4a   :  { %v2011_v56 = vpop.permute.xlu0 %2010 }
0x1f4b   :  { %v2013_v57 = vmul.f32 %v2011_v56, %v1996_v51 }
0x1f4d   :  { %2018 = vrot.lane.b32.xlu1 %v2013_v57, %s3440_s15 }
0x1fbf   :  { %v2019_v58 = vpop.permute.xlu1 %2018 }
0x1fc0   :  { %2519 = vmatmul.mubr.msk.f32.vlgmr.msra.gmra.mrb[18].mxu0 %vm134_vm1, %v2019_v58 }
0x1fc1   :  { %2967 = vmatpush3.bf16.msra.mxu0 %v3612_v5  ;;  %2810 = vmatprep.mubr.msk.f32.mxu0 %vm3436_vm0, %v3437_v1  ;;  %v2015_v5 = vld [vmem:[#allocation6 + $0x60] sm:$0xff] }
0x1fc2   :  { %2968 = vmatprep.subr.bf16.mxu0 %v3435_v0 }
0x1fc4   :  { %2811 = vmatmul.mubr.msk.f32.vlgmr.msra.gmra.mrb[20].mxu0 %vm134_vm1, %v2019_v58 }
0x1fc5   :  { %2970 = vmatpush3.bf16.msra.mxu0 %v3618_v9  ;;  %2829 = vmatprep.mubr.msk.f32.mxu0 %vm3436_vm0, %v3437_v1 }
0x1fc6   :  { %2971 = vmatprep.subr.bf16.mxu0 %v3435_v0 }
0x1fc9   :  { %2973 = vmatpush3.bf16.msra.mxu0 %v3622_v13 }
0x1fca   :  { %2974 = vmatprep.subr.bf16.mxu0 %v3435_v0 }
0x1fcd   :  { %2976 = vmatpush3.bf16.msra.mxu0 %v3628_v16 }
0x1fce   :  { %2977 = vmatprep.subr.bf16.mxu0 %v3435_v0 }
0x1fd1   :  { %2979 = vmatpush3.bf16.msra.mxu0 %v3632_v19 }
0x2093   :  { %v2088_v60 = vpop.f32.mrb[18].mxu0 }
0x2094   :  { %v2093_v61 = vadd.f32 %v2088_v60, %v2015_v5  ;;  %v2090_v9 = vpop.f32.mrb[19].mxu0 }
0x2095   :  { %v2094_v62 = vadd.f32 %v2090_v9, %v2016_v59 }
0x2096   :  { %v2520_v63 = vmul.f32 -1.442695, %v2093_v61 }
0x2097   :  { %v2521_v1 = vmul.f32 -1.442695, %v2094_v62  ;;  %v2186_v2 = vpop.f32.mrb[20].mxu0 }
0x2098   :  { %3135 = vpow2.f32 %v2520_v63  ;;  %v2812_v3 = vpop.f32.mrb[21].mxu0 }
0x2099   :  { %3137 = vpow2.f32 %v2521_v1 }
0x209a   :  { %3139 = vtanh.f32 %v2094_v62 }
0x20a2   :  { %v3136_v13 = vpop.eup %3135 }
0x20a3   :  { %v3138_v4 = vpop.eup %3137  ;;  %v2103_v6 = vadd.f32 1.0, %v3136_v13 }
0x20a4   :  { %v2104_v16 = vadd.f32 1.0, %v3138_v4  ;;  %v3140_v0 = vpop.eup %3139 }
0x20a6   :  { %3141 = vrcp.f32 %v2104_v16 }
0x20a7   :  { %3143 = vrcp.f32 %v2103_v6 }
0x20b0   :  { %v3142_v19 = vpop.eup %3141 }
0x20b1   :  { %v3144_v7 = vpop.eup %3143  ;;  %v2110_v8 = vsel %vm164_vm6, %v3140_v0, %v3142_v19 }
0x20b2   :  { %v2112_v10 = vmul.f32 %v3144_v7, %v2110_v8  ;;  %v2111_v12 = vmul.f32 %v3144_v7, %v3893_v36 }
0x20b4   :  { %2114 = vrot.lane.b32.xlu0 %v2112_v10, %s3441_s16 }
0x2126   :  { %v2115_v14 = vpop.permute.xlu0 %2114 }
0x2127   :  { %v2117_v15 = vadd.f32 %v2115_v14, %v2111_v12 }
0x2129   :  { %3145 = vtanh.f32 %v2117_v15 }
0x2133   :  { %v3146_v17 = vpop.eup %3145 }
0x2134   :  { %v2119_v18 = vmul.f32 %v3146_v17, %v2110_v8 }
0x2136   :  { %2191 = vrot.lane.b32.xlu1 %v2119_v18, %s3441_s16 }
0x21a8   :  { %v2192_v20 = vpop.permute.xlu1 %2191 }
0x21a9   :  { %2830 = vmatmul.mubr.msk.f32.vlgmr.msra.gmra.mrb[22].mxu0 %vm131_vm2, %v2192_v20 }
0x227c   :  { %v2261_v21 = vpop.f32.mrb[22].mxu0 }
0x227d   :  { %v2262_v22 = vadd.f32 %v2261_v21, %v2186_v2  ;;  %v2831_v23 = vpop.f32.mrb[23].mxu0 }
0x227f   :  { %v2265_v26 = vadd.f32 %v3167_v25, %v2262_v22 }
0x2281   :  { %v2524_v27 = vmul.f32 -1.442695, %v2265_v26 }
0x2283   :  { %3147 = vpow2.f32 %v2524_v27 }
0x2284   :  { %3149 = vtanh.f32 %v2265_v26 }
0x228d   :  { %v3148_v28 = vpop.eup %3147 }
0x228e   :  { %v2270_v48 = vadd.f32 1.0, %v3148_v28  ;;  %v3150_v29 = vpop.eup %3149 }
0x2290   :  { %3151 = vrcp.f32 %v2270_v48 }
0x229a   :  { %v3152_v30 = vpop.eup %3151 }
0x229b   :  { %v2273_v31 = vsel %vm3649_vm5, %v3150_v29, %v3152_v30 }
0x229c   :  { %2276 = vrot.lane.b32.xlu0 %v2273_v31, %s3438_s13  ;;  %v2274_v35 = vmul.f32 %v2273_v31, %v3906_v54 }
0x230e   :  { %v2277_v32 = vpop.permute.xlu0 %2276 }
0x230f   :  { %v2279_v33 = vmul.f32 %v2277_v32, %v2273_v31 }
0x2311   :  { %2281 = vrot.lane.b32.xlu1 %v2279_v33, %s3431_s28  ;;  %s2437_s28 = sshll.u32 %s3442_s7, 4  ;;  %s2438_s28 = int_to_ptr.vmem [resolvable:$true] %s2437_s28 }
0x2312   :  { %s3322_s17 = scalar_lea.vmem %s2438_s28, 128  ;;  %p3327_p1 = scmp.lt.s32.totalorder %s2438_s28, %s2438_s28 }
0x2313   :  { %p3323_p0 = scmp.ne.s32.totalorder %s2438_s28, %s3322_s17  ;;  %p3328_p2 = scmp.lt.s32.totalorder %s3322_s17, %s3322_s17 }
0x2315   :  { %p3329_p3 = por %p3328_p2, %p3327_p1 }
0x2317   :  { %p3330_p4 = pnand %p3329_p3, %p3323_p0 }
0x2383   :  { %v2282_v36 = vpop.permute.xlu1 %2281 }
0x2384   :  { %v2284_v37 = vadd.f32 %v2282_v36, %v2274_v35 }
0x2386   :  { %3153 = vtanh.f32 %v2284_v37 }
0x2390   :  { %v3154_v38 = vpop.eup %3153 }
0x2391   :  { %2287 = vrot.lane.b32.xlu0 %v3154_v38, %s3439_s14 }
0x2403   :  { %v2288_v39 = vpop.permute.xlu0 %2287 }
0x2404   :  { %v2290_v40 = vmul.f32 %v2288_v39, %v2273_v31 }
0x2406   :  { %2295 = vrot.lane.b32.xlu1 %v2290_v40, %s3440_s15 }
0x2478   :  { %v2296_v34 = vpop.permute.xlu1 %2295 }
0x2479   :  { %2403 = vst.msk [vmem:[#allocation3] sm:$0xff] %vm134_vm1, %v2296_v34  ;;  %2418 = vst.msk [vmem:[#allocation19] sm:$0xff] %vm134_vm1, %v2296_v34  ;;  %2525 = vmatmul.mubr.msk.f32.vlgmr.msra.gmra.mrb[22].mxu1 %vm134_vm1, %v2296_v34 }
0x254c   :  { %v2365_v43 = vpop.f32.mrb[22].mxu1 }
0x254d   :  { %v2370_v45 = vadd.f32 %v2365_v43, %v2292_v41  ;;  %v2367_v46 = vpop.f32.mrb[23].mxu1 }
0x254e   :  { %v2371_v47 = vadd.f32 %v2367_v46, %v2293_v42 }
0x254f   :  { %v2526_v49 = vmul.f32 -1.442695, %v2370_v45 }
0x2550   :  { %v2527_v44 = vmul.f32 -1.442695, %v2371_v47 }
0x2551   :  { %3155 = vpow2.f32 %v2526_v49 }
0x2552   :  { %3157 = vpow2.f32 %v2527_v44 }
0x2553   :  { %3159 = vtanh.f32 %v2371_v47 }
0x255b   :  { %v3156_v51 = vpop.eup %3155 }
0x255c   :  { %v3158_v50 = vpop.eup %3157  ;;  %v2380_v52 = vadd.f32 1.0, %v3156_v51 }
0x255d   :  { %v2381_v53 = vadd.f32 1.0, %v3158_v50  ;;  %v3160_v24 = vpop.eup %3159 }
0x255f   :  { %3161 = vrcp.f32 %v2381_v53 }
0x2560   :  { %3163 = vrcp.f32 %v2380_v52 }
0x2569   :  { %v3162_v54 = vpop.eup %3161 }
0x256a   :  { %v3164_v55 = vpop.eup %3163  ;;  %v2387_v56 = vsel %vm164_vm6, %v3160_v24, %v3162_v54 }
0x256b   :  { %v2389_v57 = vmul.f32 %v3164_v55, %v2387_v56  ;;  %v2388_v58 = vmul.f32 %v3164_v55, %v2117_v15 }
0x256d   :  { %2391 = vrot.lane.b32.xlu0 %v2389_v57, %s3441_s16 }
0x25df   :  { %v2392_v5 = vpop.permute.xlu0 %2391 }
0x25e0   :  { %v2394_v59 = vadd.f32 %v2392_v5, %v2388_v58 }
0x25e2   :  { %3165 = vtanh.f32 %v2394_v59  ;;  %2405 = vrot.lane.b32.xlu0 %v2394_v59, %s3441_s16 }
0x25e3   :  { %3333 = shalt.err (!%p3330_p4)
}
0x25e4   :  { %s3334_s20 = scalar_lea.hbm %s4014_s10, 128 }
0x25e5   :  { %p3335_p5 = scmp.ne.s32.totalorder %s4014_s10, %s3334_s20  ;;  %p3338_p6 = scmp.lt.u32.totalorder %s3334_s20, %s4014_s10 }
0x25e7   :  { %p3340_p7 = pnand %p3338_p6, %p3335_p5 }
0x25e9   :  { %3343 = shalt.err (!%p3340_p7)
}
0x25ea   :  { %2440 = dma.vmem_to_hbm [thread:$0]  %s2438_s28, 128, %s4014_s10, [#allocation20]  }
0x25eb   :  { %s3443_s22 = smov 112   ;;  %s3444_s4 = smov [#allocation21]  }
0x25ec   :  { %v3166_v11 = vpop.eup %3165  ;;  %s2447_s3 = sshll.u32 %s3444_s4, 4  ;;  %s2448_s3 = int_to_ptr.vmem [resolvable:$true] %s2447_s3 }
0x25ed   :  { %v2396_v60 = vmul.f32 %v3166_v11, %v2387_v56  ;;  %s3344_s8 = scalar_lea.vmem %s2448_s3, 128  ;;  %p3349_p9 = scmp.lt.s32.totalorder %s2448_s3, %s2448_s3 }
0x25ee   :  { %p3345_p8 = scmp.ne.s32.totalorder %s2448_s3, %s3344_s8  ;;  %p3350_p10 = scmp.lt.s32.totalorder %s3344_s8, %s3344_s8 }
0x25ef   :  { %2398 = vrot.lane.b32.xlu1 %v2396_v60, %s3441_s16 }
0x25f0   :  { %p3351_p11 = por %p3350_p10, %p3349_p9 }
0x25f2   :  { %p3352_p12 = pnand %p3351_p11, %p3345_p8 }
0x25f3   :  { %2410 = vrot.lane.b32.xlu1 %v2284_v37, %s3443_s22 }
0x2654   :  { %v2406_v61 = vpop.permute.xlu0 %2405 }
0x2655   :  { %2408 = vst.msk [vmem:[#allocation4] sm:$0xff] %vm131_vm2, %v2406_v61  ;;  %2419 = vst.msk [vmem:[#allocation21] sm:$0xff] %vm131_vm2, %v2406_v61 }
0x2656   :  { %3355 = shalt.err (!%p3352_p12)
}
0x2657   :  { %s3356_s27 = scalar_lea.hbm %s4015_s11, 128 }
0x2658   :  { %p3357_p13 = scmp.ne.s32.totalorder %s4015_s11, %s3356_s27  ;;  %p3360_p0 = scmp.lt.u32.totalorder %s3356_s27, %s4015_s11 }
0x265a   :  { %p3362_p1 = pnand %p3360_p0, %p3357_p13 }
0x265c   :  { %3365 = shalt.err (!%p3362_p1)
}
0x265d   :  { %2450 = dma.vmem_to_hbm [thread:$0]  %s2448_s3, 128, %s4015_s11, [#allocation20]  }
0x265e   :  { %s3445_s16 = smov [#allocation18]   ;;  %s3446_s2 = smov [#allocation22]  }
0x265f   :  { %s2427_s18 = sshll.u32 %s3445_s16, 4  ;;  %s2457_s7 = sshll.u32 %s3446_s2, 4  ;;  %s2428_s18 = int_to_ptr.vmem [resolvable:$true] %s2427_s18  ;;  %s2458_s7 = int_to_ptr.vmem [resolvable:$true] %s2457_s7 }
0x2660   :  { %s3366_s28 = scalar_lea.vmem %s2428_s18, 128  ;;  %p3371_p3 = scmp.lt.s32.totalorder %s2428_s18, %s2428_s18 }
0x2661   :  { %v2399_v9 = vpop.permute.xlu1 %2398  ;;  %p3367_p2 = scmp.ne.s32.totalorder %s2428_s18, %s3366_s28  ;;  %p3372_p4 = scmp.lt.s32.totalorder %s3366_s28, %s3366_s28 }
0x2662   :  { %2401 = vst.msk [vmem:[#allocation2] sm:$0xff] %vm131_vm2, %v2399_v9  ;;  %2417 = vst.msk [vmem:[#allocation18] sm:$0xff] %vm131_vm2, %v2399_v9 }
0x2663   :  { %p3373_p5 = por %p3372_p4, %p3371_p3 }
0x2665   :  { %p3374_p6 = pnand %p3373_p5, %p3367_p2 }
0x2667   :  { %3377 = shalt.err (!%p3374_p6)
}
0x2668   :  { %s3378_s11 = scalar_lea.hbm %s4013_s9, 128 }
0x2669   :  { %p3379_p7 = scmp.ne.s32.totalorder %s4013_s9, %s3378_s11  ;;  %p3382_p8 = scmp.lt.u32.totalorder %s3378_s11, %s4013_s9 }
0x266b   :  { %p3384_p9 = pnand %p3382_p8, %p3379_p7 }
0x266d   :  { %3387 = shalt.err (!%p3384_p9)
}
0x266e   :  { %2430 = dma.vmem_to_hbm [thread:$0]  %s2428_s18, 128, %s4013_s9, [#allocation8]   ;;  %v2411_v62 = vpop.permute.xlu1 %2410 }
0x266f   :  { %2413 = vst.msk [vmem:[#allocation5] sm:$0xff] %vm134_vm1, %v2411_v62  ;;  %2420 = vst.msk [vmem:[#allocation22] sm:$0xff] %vm134_vm1, %v2411_v62  ;;  %s3388_s0 = scalar_lea.vmem %s2458_s7, 128  ;;  %p3393_p11 = scmp.lt.s32.totalorder %s2458_s7, %s2458_s7 }
0x2670   :  { %p3389_p10 = scmp.ne.s32.totalorder %s2458_s7, %s3388_s0  ;;  %p3394_p12 = scmp.lt.s32.totalorder %s3388_s0, %s3388_s0 }
0x2672   :  { %p3395_p13 = por %p3394_p12, %p3393_p11 }
0x2674   :  { %p3396_p0 = pnand %p3395_p13, %p3389_p10 }
0x2676   :  { %3399 = shalt.err (!%p3396_p0)
}
0x2677   :  { %s3400_s4 = scalar_lea.hbm %s4016_s12, 128 }
0x2678   :  { %p3401_p1 = scmp.ne.s32.totalorder %s4016_s12, %s3400_s4  ;;  %p3404_p2 = scmp.lt.u32.totalorder %s3400_s4, %s4016_s12 }
0x267a   :  { %p3406_p3 = pnand %p3404_p2, %p3401_p1 }
0x267c   :  { %3409 = shalt.err (!%p3406_p3)
}
0x267d   :  { %2460 = dma.vmem_to_hbm [thread:$0]  %s2458_s7, 128, %s4016_s12, [#allocation23]  }
0x267e   :  { %3418 = dma.done.wait [#allocation8], 128  }
0x267f   :  { %3419 = vsyncadd [#allocation8], 4294967168 }
0x2680   :  { %3420 = dma.done.wait [#allocation20], 256  }
0x2681   :  { %3421 = vsyncadd [#allocation20], 4294967040 }
0x2682   :  { %3422 = dma.done.wait [#allocation23], 128  }
0x2683   :  { %3423 = vsyncadd [#allocation23], 4294967168 }
0x2684   :  { %2473 = vsyncpa [#allocation7], 1 }
0x2685   :  { %2474 = vsyncpa [#allocation10], 1 }
0x2686   :  { %2475 = vsyncpa [#allocation13], 1 }
0x2687   :  { %2476 = vsyncpa [#allocation16], 1 }
0x2688   :  { %2477 = vsyncpa [#allocation8], 1 }
0x2689   :  { %2478 = vsyncpa [#allocation20], 1 }
0x268a   :  { %2479 = vsyncpa [#allocation23], 1 }

</bundles_post_ra>
